<compile_context>
chip_gen: v7x
topology: tpu7x:2x2x1
jax: 0.10.0
libtpu: 0.0.40
codegen_flags: <defaults>
</compile_context>

<pallas_src>
import functools

import jax
import jax.numpy as jnp
from jax.experimental import pallas as pl
from jax.experimental.pallas import tpu as pltpu

LANE = 128          # TPU lane width; every feature dim is zero-padded to this.
EPS = 1e-5
BF16 = jnp.bfloat16


# ----------------------------------------------------------------------------- helpers
def _round_up(v, m):
    return ((v + m - 1) // m) * m


def _pad2d(a, rows, cols):
    return jnp.pad(a, ((0, rows - a.shape[0]), (0, cols - a.shape[1])))


def _layernorm(x, gamma, beta, c_in):
    """Per-row LayerNorm over the first c_in lanes (remaining lanes are zero padding), f32."""
    mask = jax.lax.broadcasted_iota(jnp.int32, x.shape, 1) < c_in
    mean = jnp.sum(x, axis=-1, keepdims=True) * (1.0 / c_in)      # padded lanes are 0
    diff = jnp.where(mask, x - mean, 0.0)
    var = jnp.sum(diff * diff, axis=-1, keepdims=True) * (1.0 / c_in)
    return diff * jax.lax.rsqrt(var + EPS) * gamma + beta


# ----------------------------------------------------------------------------- kernels
def fused_kernel(x_ref, ea_ref, gamma_ref, beta_ref, wg_ref, bg_ref,
                 we_ref, be_ref, a_ref, s_ref, o_ref, *, c_in):
    """Whole layer in one VMEM-resident call (small graphs): one launch, no HBM round trips."""
    xln = _layernorm(x_ref[...], gamma_ref[...], beta_ref[...], c_in)                  # f32
    y = jnp.dot(xln.astype(BF16), wg_ref[...], preferred_element_type=jnp.float32)     # LN(x)@W
    ef = jnp.dot(ea_ref[...].astype(BF16), we_ref[...], preferred_element_type=jnp.float32)
    ef = jnp.maximum(ef + be_ref[...], 0.0)                                            # edge_proj
    conv = jnp.dot(a_ref[...], y.astype(BF16), preferred_element_type=jnp.float32)     # A @ y
    eagg = jnp.dot(s_ref[...], ef.astype(BF16), preferred_element_type=jnp.float32)    # S @ ef
    o_ref[...] = jnp.maximum(conv + eagg + bg_ref[...], 0.0)


def ln_proj_kernel(x_ref, gamma_ref, beta_ref, wg_ref, y_ref, *, c_in):
    """y = LayerNorm(x) @ W_gcn (bf16) -- W pre-applied so aggregation is a single matmul."""
    xln = _layernorm(x_ref[...], gamma_ref[...], beta_ref[...], c_in)
    y = jnp.dot(xln.astype(BF16), wg_ref[...], preferred_element_type=jnp.float32)
    y_ref[...] = y.astype(y_ref.dtype)


def edge_proj_kernel(ea_ref, we_ref, be_ref, ef_ref):
    """edge_features = ReLU(edge_attr @ W_e + b_e) (bf16); Dropout is identity in eval."""
    ef = jnp.dot(ea_ref[...].astype(BF16), we_ref[...], preferred_element_type=jnp.float32)
    ef_ref[...] = jnp.maximum(ef + be_ref[...], 0.0).astype(ef_ref.dtype)


def aggregate_kernel(m_ref, z_ref, b_ref, o_ref, acc_ref):
    """out_tile = ReLU([A|S]_tile @ [y;ef] + b) with a K-blocked f32 VMEM accumulator."""
    k = pl.program_id(1)

    @pl.when(k == 0)
    def _():
        acc_ref[...] = jnp.zeros_like(acc_ref)

    acc_ref[...] += jnp.dot(m_ref[...], z_ref[...], preferred_element_type=jnp.float32)

    @pl.when(k == pl.num_programs(1) - 1)
    def _():
        o_ref[...] = jnp.maximum(acc_ref[...] + b_ref[...], 0.0)


# ----------------------------------------------------------------------------- graph / param prep
def build_graph_operators(edge_index, num_nodes):
    """Dense GCN sym-norm adjacency (with self loops) and dst-scatter matrix, f32."""
    src, dst = edge_index[0], edge_index[1]
    num_edges = edge_index.shape[1]
    self_idx = jnp.arange(num_nodes, dtype=edge_index.dtype)
    src_sl = jnp.concatenate([src, self_idx])
    dst_sl = jnp.concatenate([dst, self_idx])
    ones = jnp.ones((num_edges + num_nodes,), jnp.float32)
    deg = jnp.zeros((num_nodes,), jnp.float32).at[dst_sl].add(ones)
    dinv = jnp.where(deg > 0, jax.lax.rsqrt(deg), 0.0)
    norm = dinv[src_sl] * dinv[dst_sl]
    a_norm = jnp.zeros((num_nodes, num_nodes), jnp.float32).at[dst_sl, src_sl].add(norm)
    s_mat = (jnp.zeros((num_nodes, num_edges), jnp.float32)
             .at[dst, jnp.arange(num_edges)].add(1.0))
    return a_norm, s_mat


FUSED_BYTES_BUDGET = 8 * 1024 * 1024   # keep the one-call residency far below v7x's 64 MiB VMEM


def prepare_graph(edge_index, num_nodes, num_edges, *, mode=None,
                  node_tile=256, edge_tile=512, k_tile=256):
    """Build + pad + bf16-cast the dense graph operators ONCE (hoisted out of the hot path)."""
    a_norm, s_mat = build_graph_operators(edge_index, num_nodes)

    n_f = _round_up(num_nodes, LANE)
    e_f = _round_up(num_edges, LANE)
    fused_bytes = (2 * n_f * n_f + 2 * n_f * e_f          # A, S (bf16)
                   + 4 * LANE * (2 * n_f + e_f)           # x, out, edge_attr (f32)
                   + 2 * LANE * (n_f + e_f))              # y, ef intermediates (bf16)
    if mode is None:
        mode = "fused" if fused_bytes <= FUSED_BYTES_BUDGET else "tiled"

    if mode == "fused":
        return {
            "mode": "fused", "n_pad": n_f, "e_pad": e_f,
            "a": _pad2d(a_norm, n_f, n_f).astype(BF16),
            "s": _pad2d(s_mat, n_f, e_f).astype(BF16),
        }

    # Tiled path: one combined operator [A_norm | S] so aggregation is a single matmul per tile.
    n_p = _round_up(num_nodes, max(node_tile, k_tile))
    e_p = _round_up(num_edges, max(edge_tile, k_tile))
    m_pad = jnp.concatenate(
        [_pad2d(a_norm, n_p, n_p), _pad2d(s_mat, n_p, e_p)], axis=1).astype(BF16)
    return {
        "mode": "tiled", "n_pad": n_p, "e_pad": e_p, "m": m_pad,
        "node_tile": node_tile, "edge_tile": edge_tile, "k_tile": k_tile,
    }


def prepare_params(params):
    """Pad feature dims to the 128-lane width and cast matmul weights to bf16 ONCE."""
    return {
        "gamma": _pad2d(params["ln_gamma"], 1, LANE),
        "beta": _pad2d(params["ln_beta"], 1, LANE),
        "w_gcn": _pad2d(params["w_gcn"], LANE, LANE).astype(BF16),
        "b_gcn": _pad2d(params["b_gcn"], 1, LANE),
        "w_edge": _pad2d(params["w_edge"], LANE, LANE).astype(BF16),
        "b_edge": _pad2d(params["b_edge"], 1, LANE),
    }


# ----------------------------------------------------------------------------- layer call
def cognn_layer_pallas(x, edge_attr, graph, pp, *, c_out):
    n, c_in = x.shape
    n_pad, e_pad = graph["n_pad"], graph["e_pad"]

    # Runtime inputs: zero-pad feature dims to lane width so all loads/stores are lane-dense.
    x_p = _pad2d(x, n_pad, LANE)
    ea_p = _pad2d(edge_attr, e_pad, LANE)

    if graph["mode"] == "fused":
        out_pad = pl.pallas_call(
            functools.partial(fused_kernel, c_in=c_in),
            out_shape=jax.ShapeDtypeStruct((n_pad, LANE), jnp.float32),
        )(x_p, ea_p, pp["gamma"], pp["beta"], pp["w_gcn"], pp["b_gcn"],
          pp["w_edge"], pp["b_edge"], graph["a"], graph["s"])
        return out_pad[:n, :c_out]

    nt, et, kt = graph["node_tile"], graph["edge_tile"], graph["k_tile"]
    row = lambda i: (i, 0)     # row-tiled operand
    rep = lambda i: (0, 0)     # resident (tiny) operand, same block every step

    # ---- pass 1: y = LN(x) @ W_gcn -> bf16, 256-row tiles ----
    y = pl.pallas_call(
        functools.partial(ln_proj_kernel, c_in=c_in),
        out_shape=jax.ShapeDtypeStruct((n_pad, LANE), BF16),
        grid=(n_pad // nt,),
        in_specs=[pl.BlockSpec((nt, LANE), row),
                  pl.BlockSpec((1, LANE), rep),
                  pl.BlockSpec((1, LANE), rep),
                  pl.BlockSpec((LANE, LANE), rep)],
        out_specs=pl.BlockSpec((nt, LANE), row),
        compiler_params=pltpu.CompilerParams(dimension_semantics=("parallel",)),
    )(x_p, pp["gamma"], pp["beta"], pp["w_gcn"])

    # ---- pass 2: edge_features = ReLU(edge_attr @ W_e + b_e) -> bf16, 512-row tiles ----
    ef = pl.pallas_call(
        edge_proj_kernel,
        out_shape=jax.ShapeDtypeStruct((e_pad, LANE), BF16),
        grid=(e_pad // et,),
        in_specs=[pl.BlockSpec((et, LANE), row),
                  pl.BlockSpec((LANE, LANE), rep),
                  pl.BlockSpec((1, LANE), rep)],
        out_specs=pl.BlockSpec((et, LANE), row),
        compiler_params=pltpu.CompilerParams(dimension_semantics=("parallel",)),
    )(ea_p, pp["w_edge"], pp["b_edge"])

    # ---- pass 3: out = ReLU([A|S] @ [y ; ef] + b_gcn), 256-row MXU tiles, K-blocked ----
    z = jnp.concatenate([y, ef], axis=0)                     # (n_pad + e_pad, LANE) bf16
    k_total = n_pad + e_pad
    out_pad = pl.pallas_call(
        aggregate_kernel,
        out_shape=jax.ShapeDtypeStruct((n_pad, LANE), jnp.float32),
        grid=(n_pad // nt, k_total // kt),
        in_specs=[pl.BlockSpec((nt, kt), lambda i, k: (i, k)),      # [A|S] tile (bf16)
                  pl.BlockSpec((kt, LANE), lambda i, k: (k, 0)),    # [y;ef] K-block (bf16)
                  pl.BlockSpec((1, LANE), lambda i, k: (0, 0))],    # b_gcn (f32)
        out_specs=pl.BlockSpec((nt, LANE), lambda i, k: (i, 0)),
        scratch_shapes=[pltpu.VMEM((nt, LANE), jnp.float32)],
        compiler_params=pltpu.CompilerParams(
            dimension_semantics=("parallel", "arbitrary"),
            vmem_limit_bytes=48 * 1024 * 1024),   # safe on v7x's 64 MiB; ample for these tiles
    )(graph["m"], z, pp["b_gcn"])
    return out_pad[:n, :c_out]


# ----------------------------------------------------------------------------- params / reference
def init_params(key, in_channels, out_channels, edge_feature_dim=16):
    k1, k2, k3, k4 = jax.random.split(key, 4)
    scale_g = 1.0 / jnp.sqrt(in_channels)
    scale_e = 1.0 / jnp.sqrt(edge_feature_dim)
    return {
        "ln_gamma": jnp.ones((1, in_channels), jnp.float32),
        "ln_beta": jnp.zeros((1, in_channels), jnp.float32),
        "w_gcn": jax.random.uniform(k1, (in_channels, out_channels), jnp.float32,
                                    -scale_g, scale_g),
        "b_gcn": jax.random.uniform(k2, (1, out_channels), jnp.float32,
                                    -scale_g, scale_g),
        "w_edge": jax.random.uniform(k3, (edge_feature_dim, out_channels), jnp.float32,
                                     -scale_e, scale_e),
        "b_edge": jax.random.uniform(k4, (1, out_channels), jnp.float32,
                                     -scale_e, scale_e),
    }


def cognn_layer_ref(x, edge_attr, a_norm, s_mat, params):
    """Pure-JAX f32 reference with the original op ordering."""
    mu = jnp.mean(x, axis=-1, keepdims=True)
    var = jnp.mean((x - mu) ** 2, axis=-1, keepdims=True)
    x_ln = (x - mu) * jax.lax.rsqrt(var + EPS) * params["ln_gamma"] + params["ln_beta"]
    conv = a_norm @ (x_ln @ params["w_gcn"]) + params["b_gcn"]
    ef = jnp.maximum(edge_attr @ params["w_edge"] + params["b_edge"], 0.0)
    return jnp.maximum(conv + s_mat @ ef, 0.0)


if __name__ == "__main__":
    key = jax.random.PRNGKey(0)
    k_x, k_ei, k_ea, k_p, k_x2, k_ei2, k_ea2 = jax.random.split(key, 7)

    C_IN, C_OUT, F_E = 8, 32, 16
    params = init_params(k_p, C_IN, C_OUT, F_E)
    pp = prepare_params(params)           # padded / bf16-cast once, reused across calls

    # --- small graph: auto-dispatches to the single fused kernel ---
    N, E = 64, 160
    x = jax.random.normal(k_x, (N, C_IN), jnp.float32)
    edge_index = jax.random.randint(k_ei, (2, E), 0, N, dtype=jnp.int32)
    edge_attr = jax.random.normal(k_ea, (E, F_E), jnp.float32)
    graph = prepare_graph(edge_index, N, E)
    assert graph["mode"] == "fused"
    out = jax.block_until_ready(cognn_layer_pallas(x, edge_attr, graph, pp, c_out=C_OUT))
    a_norm, s_mat = build_graph_operators(edge_index, N)
    ref = cognn_layer_ref(x, edge_attr, a_norm, s_mat, params)
    assert out.shape == (N, C_OUT) and out.dtype == jnp.float32
    assert jnp.allclose(out, ref, rtol=5e-2, atol=5e-2), float(jnp.max(jnp.abs(out - ref)))

    # --- larger graph: forces the tiled / K-blocked aggregation path (256-row MXU tiles) ---
    N2, E2 = 512, 1900
    x2 = jax.random.normal(k_x2, (N2, C_IN), jnp.float32)
    edge_index2 = jax.random.randint(k_ei2, (2, E2), 0, N2, dtype=jnp.int32)
    edge_attr2 = jax.random.normal(k_ea2, (E2, F_E), jnp.float32)
    graph2 = prepare_graph(edge_index2, N2, E2, mode="tiled")
    out2 = jax.block_until_ready(cognn_layer_pallas(x2, edge_attr2, graph2, pp, c_out=C_OUT))
    a2, s2 = build_graph_operators(edge_index2, N2)
    ref2 = cognn_layer_ref(x2, edge_attr2, a2, s2, params)
    assert out2.shape == (N2, C_OUT) and out2.dtype == jnp.float32
    assert jnp.allclose(out2, ref2, rtol=5e-2, atol=5e-2), float(jnp.max(jnp.abs(out2 - ref2)))

    print("KERNEL_OK")
</pallas_src>

<mosaic_0001>
module attributes {stable_mosaic.version = 11 : i64} {
  func.func @fused_kernel(%arg0: memref<128x128xf32, #tpu.memory_space<vmem>>, %arg1: memref<256x128xf32, #tpu.memory_space<vmem>>, %arg2: memref<1x128xf32, #tpu.memory_space<vmem>>, %arg3: memref<1x128xf32, #tpu.memory_space<vmem>>, %arg4: memref<128x128xbf16, #tpu.memory_space<vmem>>, %arg5: memref<1x128xf32, #tpu.memory_space<vmem>>, %arg6: memref<128x128xbf16, #tpu.memory_space<vmem>>, %arg7: memref<1x128xf32, #tpu.memory_space<vmem>>, %arg8: memref<128x128xbf16, #tpu.memory_space<vmem>>, %arg9: memref<128x256xbf16, #tpu.memory_space<vmem>>, %arg10: memref<128x128xf32, #tpu.memory_space<vmem>>) attributes {dimension_semantics = [], scalar_prefetch = 0 : i64, scratch_operands = 0 : i64, tpu.core_type = #tpu.core_type<tc>} {
    %c0 = arith.constant 0 : index
    %c0_0 = arith.constant 0 : index
    %0 = vector.load %arg0[%c0, %c0_0] : memref<128x128xf32, #tpu.memory_space<vmem>>, vector<128x128xf32>
    %c0_1 = arith.constant 0 : index
    %c0_2 = arith.constant 0 : index
    %1 = vector.load %arg2[%c0_1, %c0_2] : memref<1x128xf32, #tpu.memory_space<vmem>>, vector<1x128xf32>
    %c0_3 = arith.constant 0 : index
    %c0_4 = arith.constant 0 : index
    %2 = vector.load %arg3[%c0_3, %c0_4] : memref<1x128xf32, #tpu.memory_space<vmem>>, vector<1x128xf32>
    %3 = tpu.iota {dimensions = array<i32: 1>} : vector<128x128xi32>
    %c8_i32 = arith.constant 8 : i32
    %4 = vector.broadcast %c8_i32 : i32 to vector<128x128xi32>
    %5 = arith.cmpi slt, %3, %4 : vector<128x128xi32>
    %cst = arith.constant dense<0.000000e+00> : vector<128xf32>
    %6 = vector.multi_reduction <add>, %0, %cst [1] : vector<128x128xf32> to vector<128xf32>
    %7 = vector.shape_cast %6 : vector<128xf32> to vector<128x1xf32>
    %cst_5 = arith.constant 1.250000e-01 : f32
    %8 = vector.broadcast %cst_5 : f32 to vector<128x1xf32>
    %9 = arith.mulf %7, %8 : vector<128x1xf32>
    %10 = vector.broadcast %9 : vector<128x1xf32> to vector<128x128xf32>
    %11 = arith.subf %0, %10 : vector<128x128xf32>
    %cst_6 = arith.constant 0.000000e+00 : f32
    %12 = vector.broadcast %cst_6 : f32 to vector<128x128xf32>
    %13 = arith.select %5, %11, %12 : vector<128x128xi1>, vector<128x128xf32>
    %14 = arith.mulf %13, %13 : vector<128x128xf32>
    %cst_7 = arith.constant dense<0.000000e+00> : vector<128xf32>
    %15 = vector.multi_reduction <add>, %14, %cst_7 [1] : vector<128x128xf32> to vector<128xf32>
    %16 = vector.shape_cast %15 : vector<128xf32> to vector<128x1xf32>
    %cst_8 = arith.constant 1.250000e-01 : f32
    %17 = vector.broadcast %cst_8 : f32 to vector<128x1xf32>
    %18 = arith.mulf %16, %17 : vector<128x1xf32>
    %cst_9 = arith.constant 9.99999974E-6 : f32
    %19 = vector.broadcast %cst_9 : f32 to vector<128x1xf32>
    %20 = arith.addf %18, %19 : vector<128x1xf32>
    %21 = math.rsqrt %20 : vector<128x1xf32>
    %22 = vector.broadcast %21 : vector<128x1xf32> to vector<128x128xf32>
    %23 = arith.mulf %13, %22 : vector<128x128xf32>
    %24 = vector.broadcast %1 : vector<1x128xf32> to vector<128x128xf32>
    %25 = arith.mulf %23, %24 : vector<128x128xf32>
    %26 = vector.broadcast %2 : vector<1x128xf32> to vector<128x128xf32>
    %27 = arith.addf %25, %26 : vector<128x128xf32>
    %28 = arith.truncf %27 : vector<128x128xf32> to vector<128x128xbf16>
    %c0_10 = arith.constant 0 : index
    %c0_11 = arith.constant 0 : index
    %29 = vector.load %arg4[%c0_10, %c0_11] : memref<128x128xbf16, #tpu.memory_space<vmem>>, vector<128x128xbf16>
    %cst_12 = arith.constant dense<0.000000e+00> : vector<128x128xf32>
    %30 = tpu.matmul %28, %29, %cst_12 {dimension_numbers = #tpu.dot_dimension_numbers<[1], [0], [0], [1], [0, 0, 1, 1], [], []>} : vector<128x128xbf16>, vector<128x128xbf16>, vector<128x128xf32> -> vector<128x128xf32>
    %c0_13 = arith.constant 0 : index
    %c0_14 = arith.constant 0 : index
    %31 = vector.load %arg1[%c0_13, %c0_14] : memref<256x128xf32, #tpu.memory_space<vmem>>, vector<256x128xf32>
    %32 = arith.truncf %31 : vector<256x128xf32> to vector<256x128xbf16>
    %c0_15 = arith.constant 0 : index
    %c0_16 = arith.constant 0 : index
    %33 = vector.load %arg6[%c0_15, %c0_16] : memref<128x128xbf16, #tpu.memory_space<vmem>>, vector<128x128xbf16>
    %cst_17 = arith.constant dense<0.000000e+00> : vector<256x128xf32>
    %34 = tpu.matmul %32, %33, %cst_17 {dimension_numbers = #tpu.dot_dimension_numbers<[1], [0], [0], [1], [0, 0, 1, 1], [], []>} : vector<256x128xbf16>, vector<128x128xbf16>, vector<256x128xf32> -> vector<256x128xf32>
    %c0_18 = arith.constant 0 : index
    %c0_19 = arith.constant 0 : index
    %35 = vector.load %arg7[%c0_18, %c0_19] : memref<1x128xf32, #tpu.memory_space<vmem>>, vector<1x128xf32>
    %36 = vector.broadcast %35 : vector<1x128xf32> to vector<256x128xf32>
    %37 = arith.addf %34, %36 : vector<256x128xf32>
    %cst_20 = arith.constant 0.000000e+00 : f32
    %38 = vector.broadcast %cst_20 : f32 to vector<256x128xf32>
    %39 = arith.maximumf %37, %38 : vector<256x128xf32>
    %c0_21 = arith.constant 0 : index
    %c0_22 = arith.constant 0 : index
    %40 = vector.load %arg8[%c0_21, %c0_22] : memref<128x128xbf16, #tpu.memory_space<vmem>>, vector<128x128xbf16>
    %41 = arith.truncf %30 : vector<128x128xf32> to vector<128x128xbf16>
    %cst_23 = arith.constant dense<0.000000e+00> : vector<128x128xf32>
    %42 = tpu.matmul %40, %41, %cst_23 {dimension_numbers = #tpu.dot_dimension_numbers<[1], [0], [0], [1], [0, 0, 1, 1], [], []>} : vector<128x128xbf16>, vector<128x128xbf16>, vector<128x128xf32> -> vector<128x128xf32>
    %c0_24 = arith.constant 0 : index
    %c0_25 = arith.constant 0 : index
    %43 = vector.load %arg9[%c0_24, %c0_25] : memref<128x256xbf16, #tpu.memory_space<vmem>>, vector<128x256xbf16>
    %44 = arith.truncf %39 : vector<256x128xf32> to vector<256x128xbf16>
    %cst_26 = arith.constant dense<0.000000e+00> : vector<128x128xf32>
    %45 = tpu.matmul %43, %44, %cst_26 {dimension_numbers = #tpu.dot_dimension_numbers<[1], [0], [0], [1], [0, 0, 1, 1], [], []>} : vector<128x256xbf16>, vector<256x128xbf16>, vector<128x128xf32> -> vector<128x128xf32>
    %46 = arith.addf %42, %45 : vector<128x128xf32>
    %c0_27 = arith.constant 0 : index
    %c0_28 = arith.constant 0 : index
    %47 = vector.load %arg5[%c0_27, %c0_28] : memref<1x128xf32, #tpu.memory_space<vmem>>, vector<1x128xf32>
    %48 = vector.broadcast %47 : vector<1x128xf32> to vector<128x128xf32>
    %49 = arith.addf %46, %48 : vector<128x128xf32>
    %cst_29 = arith.constant 0.000000e+00 : f32
    %50 = vector.broadcast %cst_29 : f32 to vector<128x128xf32>
    %51 = arith.maximumf %49, %50 : vector<128x128xf32>
    %c0_30 = arith.constant 0 : index
    %c0_31 = arith.constant 0 : index
    %52 = vector.load %arg10[%c0_30, %c0_31] : memref<128x128xf32, #tpu.memory_space<vmem>>, vector<128x128xf32>
    tpu.vector_store %arg10[%c0_30, %c0_31], %51 {strides = array<i32>} : memref<128x128xf32, #tpu.memory_space<vmem>>, vector<128x128xf32>,
    return
  }
}

</mosaic_0001>

<bundles_post_ra>
// kernel: tpu_custom_call.1
= control target key start
LH: loop header
LB: loop body
LE: loop exit
PB: predicated region body
PF: predicated region fallthrough
CT: control target
= control target key end

     0   :  { %15 = vsyncpa [#allocation3], 0  ;;  %s2336_s0 = inlined_call_operand.hbm [shape: f32[128,128], index: 0, kind: input, shape index: {}]   ;;  %s2337_s1 = inlined_call_operand.hbm [shape: f32[256,128], index: 1, kind: input, shape index: {}]   ;;  %s2338_s2 = inlined_call_operand.vmem [shape: f32[1,128], index: 2, kind: input, shape index: {}]   ;;  %s2339_s3 = inlined_call_operand.vmem [shape: f32[1,128], index: 3, kind: input, shape index: {}]   ;;  %s2340_s4 = inlined_call_operand.hbm [shape: bf16[128,128], index: 4, kind: input, shape index: {}]   ;;  %s2341_s5 = inlined_call_operand.vmem [shape: f32[1,128], index: 5, kind: input, shape index: {}]   ;;  %s2342_s6 = inlined_call_operand.hbm [shape: bf16[128,128], index: 6, kind: input, shape index: {}]   ;;  %s2343_s7 = inlined_call_operand.vmem [shape: f32[1,128], index: 7, kind: input, shape index: {}]   ;;  %s2344_s8 = inlined_call_operand.hbm [shape: bf16[128,128], index: 8, kind: input, shape index: {}]   ;;  %s2345_s9 = inlined_call_operand.hbm [shape: bf16[128,256], index: 9, kind: input, shape index: {}]   ;;  %s2346_s10 = inlined_call_operand.hbm [shape: f32[128,128], index: 10, kind: output, shape index: {}]  }
   0x1   :  { %16 = vsyncpa [#allocation6], 0 }
   0x2   :  { %17 = vsyncpa [#allocation9], 0 }
   0x3   :  { %18 = vsyncpa [#allocation12], 0 }
   0x4   :  { %19 = vsyncpa [#allocation4], 0  ;;  %s1841_s13 = smov [#allocation5]   ;;  %s1677_s17 = scalar_lea.hbm %s2337_s1, 4096 }
   0x5   :  { %s37_s14 = sshll.u32 %s1841_s13, 4  ;;  %p1678_p0 = scmp.ne.s32.totalorder %s2337_s1, %s1677_s17  ;;  %s38_s14 = int_to_ptr.vmem [resolvable:$true] %s37_s14 }
   0x6   :  { %p1681_p1 = scmp.lt.u32.totalorder %s1677_s17, %s2337_s1 }
   0x8   :  { %p1683_p2 = pnand %p1681_p1, %p1678_p0 }
   0xa   :  { %1686 = shalt.err (!%p1683_p2)
}
   0xb   :  { %s1687_s22 = scalar_lea.vmem %s38_s14, 4096  ;;  %p1692_p4 = scmp.lt.s32.totalorder %s38_s14, %s38_s14 }
   0xc   :  { %p1688_p3 = scmp.ne.s32.totalorder %s38_s14, %s1687_s22  ;;  %p1693_p5 = scmp.lt.s32.totalorder %s1687_s22, %s1687_s22 }
   0xe   :  { %p1694_p6 = por %p1693_p5, %p1692_p4 }
  0x10   :  { %p1695_p7 = pnand %p1694_p6, %p1688_p3 }
  0x12   :  { %1698 = shalt.err (!%p1695_p7)
}
  0x13   :  { %s1842_s23 = smov 128   ;;  %s1843_s24 = smov 8  }
  0x14   :  { %43 = dma.hbm_to_vmem [thread:$0]  %s2337_s1, 4096, %s38_s14, [#allocation6], %s1842_s23, %s1842_s23, %s1843_s24  }
  0x15   :  { %s1844_s27 = smov [#allocation8]   ;;  %s1845_s29 = smov [#allocation2]  }
  0x16   :  { %s67_s28 = sshll.u32 %s1844_s27, 4  ;;  %s25_s30 = sshll.u32 %s1845_s29, 4  ;;  %s68_s28 = int_to_ptr.vmem [resolvable:$true] %s67_s28  ;;  %s26_s30 = int_to_ptr.vmem [resolvable:$true] %s25_s30 }
  0x17   :  { %s1699_s13 = scalar_lea.hbm %s2342_s6, 1024 }
  0x18   :  { %p1700_p8 = scmp.ne.s32.totalorder %s2342_s6, %s1699_s13  ;;  %p1703_p9 = scmp.lt.u32.totalorder %s1699_s13, %s2342_s6 }
  0x1a   :  { %p1705_p10 = pnand %p1703_p9, %p1700_p8 }
  0x1c   :  { %1708 = shalt.err (!%p1705_p10)
}
  0x1d   :  { %s1709_s1 = scalar_lea.vmem %s68_s28, 1024  ;;  %p1714_p12 = scmp.lt.s32.totalorder %s68_s28, %s68_s28 }
  0x1e   :  { %p1710_p11 = scmp.ne.s32.totalorder %s68_s28, %s1709_s1  ;;  %p1715_p13 = scmp.lt.s32.totalorder %s1709_s1, %s1709_s1 }
  0x20   :  { %p1716_p0 = por %p1715_p13, %p1714_p12 }
  0x22   :  { %p1717_p1 = pnand %p1716_p0, %p1710_p11 }
  0x24   :  { %1720 = shalt.err (!%p1717_p1)
}
  0x25   :  { %s1846_s14 = smov 64   ;;  %s1847_s19 = smov 4  }
  0x26   :  { %73 = dma.hbm_to_vmem [thread:$0]  %s2342_s6, 1024, %s68_s28, [#allocation9], %s1846_s14, %s1846_s14, %s1847_s19  }
  0x27   :  { %s1721_s26 = scalar_lea.hbm %s2336_s0, 2048 }
  0x28   :  { %p1722_p2 = scmp.ne.s32.totalorder %s2336_s0, %s1721_s26  ;;  %p1725_p3 = scmp.lt.u32.totalorder %s1721_s26, %s2336_s0 }
  0x2a   :  { %p1727_p4 = pnand %p1725_p3, %p1722_p2 }
  0x2c   :  { %1730 = shalt.err (!%p1727_p4)
}
  0x2d   :  { %s1731_s13 = scalar_lea.vmem %s26_s30, 2048  ;;  %p1736_p6 = scmp.lt.s32.totalorder %s26_s30, %s26_s30 }
  0x2e   :  { %p1732_p5 = scmp.ne.s32.totalorder %s26_s30, %s1731_s13  ;;  %p1737_p7 = scmp.lt.s32.totalorder %s1731_s13, %s1731_s13 }
  0x30   :  { %p1738_p8 = por %p1737_p7, %p1736_p6 }
  0x32   :  { %p1739_p9 = pnand %p1738_p8, %p1732_p5 }
  0x34   :  { %1742 = shalt.err (!%p1739_p9)
}
  0x35   :  { %31 = dma.hbm_to_vmem [thread:$0]  %s2336_s0, 2048, %s26_s30, [#allocation3], %s1842_s23, %s1842_s23, %s1843_s24  }
  0x36   :  { %s1848_s15 = smov [#allocation7]   ;;  %s1849_s17 = smov [#allocation10]  }
  0x37   :  { %s53_s16 = sshll.u32 %s1848_s15, 4  ;;  %s81_s18 = sshll.u32 %s1849_s17, 4  ;;  %s54_s16 = int_to_ptr.vmem [resolvable:$true] %s53_s16  ;;  %s82_s18 = int_to_ptr.vmem [resolvable:$true] %s81_s18 }
  0x38   :  { %s1743_s21 = scalar_lea.hbm %s2340_s4, 1024 }
  0x39   :  { %p1744_p10 = scmp.ne.s32.totalorder %s2340_s4, %s1743_s21  ;;  %p1747_p11 = scmp.lt.u32.totalorder %s1743_s21, %s2340_s4 }
  0x3b   :  { %p1749_p12 = pnand %p1747_p11, %p1744_p10 }
  0x3d   :  { %1752 = shalt.err (!%p1749_p12)
}
  0x3e   :  { %s1753_s0 = scalar_lea.vmem %s54_s16, 1024  ;;  %p1758_p0 = scmp.lt.s32.totalorder %s54_s16, %s54_s16 }
  0x3f   :  { %p1754_p13 = scmp.ne.s32.totalorder %s54_s16, %s1753_s0  ;;  %p1759_p1 = scmp.lt.s32.totalorder %s1753_s0, %s1753_s0 }
  0x41   :  { %p1760_p2 = por %p1759_p1, %p1758_p0 }
  0x43   :  { %p1761_p3 = pnand %p1760_p2, %p1754_p13 }
  0x45   :  { %1764 = shalt.err (!%p1761_p3)
}
  0x46   :  { %59 = dma.hbm_to_vmem [thread:$0]  %s2340_s4, 1024, %s54_s16, [#allocation6], %s1846_s14, %s1846_s14, %s1847_s19  }
  0x47   :  { %s1765_s13 = scalar_lea.hbm %s2344_s8, 1024 }
  0x48   :  { %p1766_p4 = scmp.ne.s32.totalorder %s2344_s8, %s1765_s13  ;;  %p1769_p5 = scmp.lt.u32.totalorder %s1765_s13, %s2344_s8 }
  0x4a   :  { %p1771_p6 = pnand %p1769_p5, %p1766_p4 }
  0x4c   :  { %1774 = shalt.err (!%p1771_p6)
}
  0x4d   :  { %s1775_s1 = scalar_lea.vmem %s82_s18, 1024  ;;  %p1780_p8 = scmp.lt.s32.totalorder %s82_s18, %s82_s18 }
  0x4e   :  { %p1776_p7 = scmp.ne.s32.totalorder %s82_s18, %s1775_s1  ;;  %p1781_p9 = scmp.lt.s32.totalorder %s1775_s1, %s1775_s1 }
  0x50   :  { %p1782_p10 = por %p1781_p9, %p1780_p8 }
  0x52   :  { %p1783_p11 = pnand %p1782_p10, %p1776_p7 }
  0x54   :  { %1786 = shalt.err (!%p1783_p11)
}
  0x55   :  { %87 = dma.hbm_to_vmem [thread:$0]  %s2344_s8, 1024, %s82_s18, [#allocation9], %s1846_s14, %s1846_s14, %s1847_s19  }
  0x56   :  { %s1850_s20 = smov [#allocation11]   ;;  %s1787_s26 = scalar_lea.hbm %s2345_s9, 2048 }
  0x57   :  { %s93_s21 = sshll.u32 %s1850_s20, 4  ;;  %p1788_p12 = scmp.ne.s32.totalorder %s2345_s9, %s1787_s26  ;;  %s94_s21 = int_to_ptr.vmem [resolvable:$true] %s93_s21 }
  0x58   :  { %p1791_p13 = scmp.lt.u32.totalorder %s1787_s26, %s2345_s9 }
  0x5a   :  { %p1793_p0 = pnand %p1791_p13, %p1788_p12 }
  0x5c   :  { %1796 = shalt.err (!%p1793_p0)
}
  0x5d   :  { %s1797_s11 = scalar_lea.vmem %s94_s21, 2048  ;;  %p1802_p2 = scmp.lt.s32.totalorder %s94_s21, %s94_s21 }
  0x5e   :  { %p1798_p1 = scmp.ne.s32.totalorder %s94_s21, %s1797_s11  ;;  %p1803_p3 = scmp.lt.s32.totalorder %s1797_s11, %s1797_s11 }
  0x60   :  { %p1804_p4 = por %p1803_p3, %p1802_p2 }
  0x62   :  { %p1805_p5 = pnand %p1804_p4, %p1798_p1 }
  0x64   :  { %1808 = shalt.err (!%p1805_p5)
}
  0x65   :  { %99 = dma.hbm_to_vmem [thread:$0]  %s2345_s9, 2048, %s94_s21, [#allocation12], %s1842_s23, %s1842_s23, %s1843_s24  }
  0x66   :  { %1831 = dma.done.wait [#allocation3], 2048  }
  0x67   :  { %1832 = vsyncadd [#allocation3], 4294965248 }
  0x68   :  { %1833 = dma.done.wait [#allocation6], 5120  }
  0x69   :  { %1834 = vsyncadd [#allocation6], 4294962176 }
  0x6a   :  { %1835 = dma.done.wait [#allocation9], 2048  }
  0x6b   :  { %1836 = vsyncadd [#allocation9], 4294965248 }
  0x6c   :  { %1837 = dma.done.wait [#allocation12], 2048  }
  0x6d   :  { %1838 = vsyncadd [#allocation12], 4294965248  ;;  %v1997_v0 = vld [vmem:[#allocation2] sm:$0xff]  ;;  %v1999_v1 = vld [vmem:[#allocation2 + $0x10] sm:$0xff] }
  0x6e   :  { %140 = vadd.xlane.f32.xlu0 %v1997_v0  ;;  %144 = vadd.xlane.f32.xlu1 %v1999_v1  ;;  %v2003_v2 = vld [vmem:[#allocation2 + $0x8] sm:$0xff]  ;;  %v2005_v3 = vld [vmem:[#allocation2 + $0x18] sm:$0xff]  ;;  %v2007_v4 = vld [vmem:[#allocation2 + $0x20] sm:$0xff] }
  0x6f   :  { %v2011_v5 = vld [vmem:[#allocation2 + $0x28] sm:$0xff]  ;;  %v2013_v6 = vld [vmem:[#allocation2 + $0x30] sm:$0xff]  ;;  %v2015_v7 = vld [vmem:[#allocation2 + $0x38] sm:$0xff] }
  0x70   :  { %v2019_v8 = vld [vmem:[#allocation2 + $0x40] sm:$0xff]  ;;  %v2021_v9 = vld [vmem:[#allocation2 + $0x48] sm:$0xff]  ;;  %v2025_v10 = vld [vmem:[#allocation2 + $0x50] sm:$0xff] }
  0x71   :  { %v2027_v11 = vld [vmem:[#allocation2 + $0x58] sm:$0xff]  ;;  %v2031_v12 = vld [vmem:[#allocation2 + $0x60] sm:$0xff]  ;;  %v2033_v13 = vld [vmem:[#allocation2 + $0x68] sm:$0xff] }
  0x72   :  { %142 = vadd.xlane.f32.xlu0 %v2003_v2  ;;  %146 = vadd.xlane.f32.xlu1 %v2005_v3  ;;  %v2037_v14 = vld [vmem:[#allocation2 + $0x70] sm:$0xff]  ;;  %v2041_v15 = vld [vmem:[#allocation2 + $0x78] sm:$0xff]  ;;  %v1597_v16 = vld [vmem:[#allocation8] sm:$0xff]  }
  0x73   :  { %1506 = vmatprep.subr.bf16.mxu1 %v1597_v16  ;;  %v1598_v17 = vld [vmem:[#allocation8 + $0x8] sm:$0xff]   ;;  %v1599_v18 = vld [vmem:[#allocation8 + $0x10] sm:$0xff]   ;;  %v545_v19 = vld [vmem:[#allocation5] sm:$0xff] }
  0x74   :  { %1507 = vmatpush3.bf16.msra.mxu1 %v1597_v16  ;;  %v546_v20 = vld [vmem:[#allocation5 + $0x8] sm:$0xff]  ;;  %v1600_v22 = vld [vmem:[#allocation8 + $0x18] sm:$0xff]   ;;  %v1601_v23 = vld [vmem:[#allocation8 + $0x20] sm:$0xff]  }
  0x75   :  { %1508 = vmatprep.subr.bf16.mxu1 %v1598_v17  ;;  %v577_v21 = vpack.c.bf16 %v546_v20, %v545_v19  ;;  %v1605_v24 = vld [vmem:[#allocation7] sm:$0xff]   ;;  %v1602_v25 = vld [vmem:[#allocation8 + $0x28] sm:$0xff]   ;;  %v1603_v26 = vld [vmem:[#allocation8 + $0x30] sm:$0xff]   ;;  %v137_v19 = vlaneseq }
  0x76   :  { %148 = vadd.xlane.f32.xlu0 %v2007_v4  ;;  %150 = vadd.xlane.f32.xlu1 %v2011_v5  ;;  %v1604_v27 = vld [vmem:[#allocation8 + $0x38] sm:$0xff]   ;;  %v547_v28 = vld [vmem:[#allocation5 + $0x10] sm:$0xff]  ;;  %v549_v30 = vld [vmem:[#allocation5 + $0x20] sm:$0xff] }
  0x77   :  { %1522 = vmatprep.mubr.bf16.mxu1 %v577_v21  ;;  %1474 = vmatprep.subr.bf16.mxu0 %v1605_v24  ;;  %v548_v29 = vld [vmem:[#allocation5 + $0x18] sm:$0xff]  ;;  %v550_v31 = vld [vmem:[#allocation5 + $0x28] sm:$0xff]  ;;  %v551_v34 = vld [vmem:[#allocation5 + $0x30] sm:$0xff] }
  0x78   :  { %1509 = vmatpush3.bf16.msra.mxu1 %v1598_v17  ;;  %1475 = vmatpush3.bf16.msra.mxu0 %v1605_v24  ;;  %v578_v32 = vpack.c.bf16 %v548_v29, %v547_v28  ;;  %v579_v33 = vpack.c.bf16 %v550_v31, %v549_v30  ;;  %v552_v35 = vld [vmem:[#allocation5 + $0x38] sm:$0xff]  ;;  %v553_v36 = vld [vmem:[#allocation5 + $0x40] sm:$0xff]  ;;  %v554_v37 = vld [vmem:[#allocation5 + $0x48] sm:$0xff] }
  0x79   :  { %1510 = vmatprep.subr.bf16.mxu1 %v1599_v18  ;;  %v580_v38 = vpack.c.bf16 %v552_v35, %v551_v34  ;;  %v581_v39 = vpack.c.bf16 %v554_v37, %v553_v36  ;;  %v555_v40 = vld [vmem:[#allocation5 + $0x50] sm:$0xff]  ;;  %v556_v41 = vld [vmem:[#allocation5 + $0x58] sm:$0xff]  ;;  %v557_v42 = vld [vmem:[#allocation5 + $0x60] sm:$0xff] }
  0x7a   :  { %152 = vadd.xlane.f32.xlu0 %v2013_v6  ;;  %154 = vadd.xlane.f32.xlu1 %v2015_v7  ;;  %v558_v43 = vld [vmem:[#allocation5 + $0x68] sm:$0xff]  ;;  %v582_v44 = vpack.c.bf16 %v556_v41, %v555_v40  ;;  %v559_v46 = vld [vmem:[#allocation5 + $0x70] sm:$0xff]  ;;  %v560_v47 = vld [vmem:[#allocation5 + $0x78] sm:$0xff] }
  0x7b   :  { %v583_v45 = vpack.c.bf16 %v558_v43, %v557_v42  ;;  %v561_v48 = vld [vmem:[#allocation5 + $0x80] sm:$0xff]  ;;  %v562_v49 = vld [vmem:[#allocation5 + $0x88] sm:$0xff]  ;;  %v584_v50 = vpack.c.bf16 %v560_v47, %v559_v46  ;;  %v563_v52 = vld [vmem:[#allocation5 + $0x90] sm:$0xff] }
  0x7c   :  { %1511 = vmatpush3.bf16.msra.mxu1 %v1599_v18  ;;  %v585_v51 = vpack.c.bf16 %v562_v49, %v561_v48  ;;  %v564_v53 = vld [vmem:[#allocation5 + $0x98] sm:$0xff]  ;;  %v565_v54 = vld [vmem:[#allocation5 + $0xa0] sm:$0xff]  ;;  %v566_v55 = vld [vmem:[#allocation5 + $0xa8] sm:$0xff] }
  0x7d   :  { %1512 = vmatprep.subr.bf16.mxu1 %v1600_v22  ;;  %v586_v56 = vpack.c.bf16 %v564_v53, %v563_v52  ;;  %v587_v57 = vpack.c.bf16 %v566_v55, %v565_v54  ;;  %v567_v58 = vld [vmem:[#allocation5 + $0xb0] sm:$0xff]  ;;  %v568_v59 = vld [vmem:[#allocation5 + $0xb8] sm:$0xff]  ;;  %v569_v61 = vld [vmem:[#allocation5 + $0xc0] sm:$0xff] }
  0x7e   :  { %156 = vadd.xlane.f32.xlu0 %v2019_v8  ;;  %158 = vadd.xlane.f32.xlu1 %v2021_v9  ;;  %v588_v60 = vpack.c.bf16 %v568_v59, %v567_v58  ;;  %v570_v62 = vld [vmem:[#allocation5 + $0xc8] sm:$0xff]  ;;  %v571_v16 = vld [vmem:[#allocation5 + $0xd0] sm:$0xff]  ;;  %v572_v17 = vld [vmem:[#allocation5 + $0xd8] sm:$0xff] }
  0x7f   :  { %v589_v63 = vpack.c.bf16 %v570_v62, %v569_v61  ;;  %v590_v18 = vpack.c.bf16 %v572_v17, %v571_v16  ;;  %v573_v20 = vld [vmem:[#allocation5 + $0xe0] sm:$0xff]  ;;  %v574_v21 = vld [vmem:[#allocation5 + $0xe8] sm:$0xff]  ;;  %v576_v24 = vld [vmem:[#allocation5 + $0xf8] sm:$0xff] }
  0x80   :  { %1513 = vmatpush3.bf16.msra.mxu1 %v1600_v22  ;;  %v591_v22 = vpack.c.bf16 %v574_v21, %v573_v20 }
  0x81   :  { %1514 = vmatprep.subr.bf16.mxu1 %v1601_v23 }
  0x82   :  { %160 = vadd.xlane.f32.xlu0 %v2025_v10  ;;  %162 = vadd.xlane.f32.xlu1 %v2027_v11 }
  0x84   :  { %1515 = vmatpush3.bf16.msra.mxu1 %v1601_v23  ;;  %v575_v23 = vld [vmem:[#allocation5 + $0xf0] sm:$0xff] }
  0x85   :  { %1516 = vmatprep.subr.bf16.mxu1 %v1602_v25 }
  0x86   :  { %164 = vadd.xlane.f32.xlu0 %v2031_v12  ;;  %166 = vadd.xlane.f32.xlu1 %v2033_v13 }
  0x88   :  { %1517 = vmatpush3.bf16.msra.mxu1 %v1602_v25  ;;  %v2045_v25 = vand.u32 127, %v137_v19 }
  0x89   :  { %1518 = vmatprep.subr.bf16.mxu1 %v1603_v26 }
  0x8a   :  { %168 = vadd.xlane.f32.xlu0 %v2037_v14  ;;  %170 = vadd.xlane.f32.xlu1 %v2041_v15  ;;  %vm139_vm0 = vcmp.lt.s32.totalorder %v2045_v25, 8  ;;  %v1611_v25 = vld [vmem:[#allocation7 + $0x30] sm:$0xff]  }
  0x8c   :  { %1519 = vmatpush3.bf16.msra.mxu1 %v1603_v26  ;;  %v592_v26 = vpack.c.bf16 %v576_v24, %v575_v23  ;;  %v1606_v24 = vld [vmem:[#allocation7 + $0x8] sm:$0xff]  }
  0x8d   :  { %1520 = vmatprep.subr.bf16.mxu1 %v1604_v27  ;;  %1476 = vmatprep.subr.bf16.mxu0 %v1606_v24 }
  0x8e   :  { %1477 = vmatpush3.bf16.msra.mxu0 %v1606_v24 }
  0x90   :  { %1521 = vmatpush3.bf16.msra.mxu1 %v1604_v27 }
  0x93   :  { %1523 = vmatmul.mubr.bf16.vlgmr.msra.gmra.mrb[0].mxu1 %v578_v32 }
  0x94   :  { %1526 = vmatprep.mubr.bf16.mxu1 %v579_v33 }
  0x9b   :  { %1527 = vmatmul.mubr.bf16.gmra.mrb[4].mxu1 %v580_v38 }
  0x9c   :  { %1530 = vmatprep.mubr.bf16.mxu1 %v581_v39 }
  0xa3   :  { %1531 = vmatmul.mubr.bf16.gmra.mrb[8].mxu1 %v582_v44 }
  0xa4   :  { %1534 = vmatprep.mubr.bf16.mxu1 %v583_v45 }
  0xab   :  { %1535 = vmatmul.mubr.bf16.gmra.mrb[12].mxu1 %v584_v50 }
  0xac   :  { %1538 = vmatprep.mubr.bf16.mxu1 %v585_v51 }
  0xb3   :  { %1539 = vmatmul.mubr.bf16.gmra.mrb[16].mxu1 %v586_v56 }
  0xb4   :  { %1542 = vmatprep.mubr.bf16.mxu1 %v587_v57 }
  0xbb   :  { %1543 = vmatmul.mubr.bf16.gmra.mrb[20].mxu1 %v588_v60 }
  0xbc   :  { %1546 = vmatprep.mubr.bf16.mxu1 %v589_v63 }
  0xc3   :  { %1547 = vmatmul.mubr.bf16.gmra.mrb[24].mxu1 %v590_v18 }
  0xc4   :  { %1550 = vmatprep.mubr.bf16.mxu1 %v591_v22 }
  0xcb   :  { %1551 = vmatmul.mubr.bf16.gmra.mrb[28].mxu1 %v592_v26 }
  0xfb   :  { %v141_v27 = vpop.xlane.xlu0 %140  ;;  %v145_v28 = vpop.xlane.xlu1 %144 }
  0xfc   :  { %v172_v29 = vmul.f32 0.125, %v141_v27  ;;  %v174_v30 = vmul.f32 0.125, %v145_v28 }
  0xfe   :  { %v188_v31 = vsub.f32 %v1997_v0, %v172_v29  ;;  %v190_v32 = vsub.f32 %v1999_v1, %v174_v30 }
  0xff   :  { %v143_v33 = vpop.xlane.xlu0 %142  ;;  %v147_v34 = vpop.xlane.xlu1 %146 }
 0x100   :  { %v173_v35 = vmul.f32 0.125, %v143_v33  ;;  %v175_v36 = vmul.f32 0.125, %v147_v34  ;;  %v2052_v37 = vsel %vm139_vm0, %v188_v31, 0.0  ;;  %v2056_v38 = vsel %vm139_vm0, %v190_v32, 0.0 }
 0x101   :  { %v220_v39 = vmul.f32 %v2052_v37, %v2052_v37  ;;  %v222_v42 = vmul.f32 %v2056_v38, %v2056_v38 }
 0x102   :  { %v189_v40 = vsub.f32 %v2003_v2, %v173_v35  ;;  %v191_v0 = vsub.f32 %v2005_v3, %v175_v36 }
 0x103   :  { %236 = vadd.xlane.f32.xlu0 %v220_v39  ;;  %v149_v1 = vpop.xlane.xlu0 %148  ;;  %v151_v41 = vpop.xlane.xlu1 %150  ;;  %v1607_v39 = vld [vmem:[#allocation7 + $0x10] sm:$0xff]  }
 0x104   :  { %v176_v43 = vmul.f32 0.125, %v149_v1  ;;  %v177_v44 = vmul.f32 0.125, %v151_v41  ;;  %v2066_v45 = vsel %vm139_vm0, %v189_v40, 0.0  ;;  %v2070_v46 = vsel %vm139_vm0, %v191_v0, 0.0  ;;  %1478 = vmatprep.subr.bf16.mxu0 %v1607_v39 }
 0x105   :  { %v221_v2 = vmul.f32 %v2066_v45, %v2066_v45  ;;  %v223_v50 = vmul.f32 %v2070_v46, %v2070_v46  ;;  %1479 = vmatpush3.bf16.msra.mxu0 %v1607_v39  ;;  %v2174_v39 = vld [vmem:[%s2338_s2] ss:$0 sm:$0xff] }
 0x106   :  { %v192_v3 = vsub.f32 %v2007_v4, %v176_v43  ;;  %v193_v47 = vsub.f32 %v2011_v5, %v177_v44  ;;  %v1608_v44 = vld [vmem:[#allocation7 + $0x18] sm:$0xff]  }
 0x107   :  { %240 = vadd.xlane.f32.xlu0 %v222_v42  ;;  %238 = vadd.xlane.f32.xlu1 %v221_v2  ;;  %v153_v48 = vpop.xlane.xlu0 %152  ;;  %v155_v49 = vpop.xlane.xlu1 %154 }
 0x108   :  { %v178_v51 = vmul.f32 0.125, %v153_v48  ;;  %v179_v52 = vmul.f32 0.125, %v155_v49  ;;  %v2080_v53 = vsel %vm139_vm0, %v192_v3, 0.0  ;;  %v2084_v54 = vsel %vm139_vm0, %v193_v47, 0.0  ;;  %1480 = vmatprep.subr.bf16.mxu0 %v1608_v44  ;;  %v1609_v47 = vld [vmem:[#allocation7 + $0x20] sm:$0xff]   ;;  %v1610_v48 = vld [vmem:[#allocation7 + $0x28] sm:$0xff]  }
 0x109   :  { %v224_v4 = vmul.f32 %v2080_v53, %v2080_v53  ;;  %v225_v58 = vmul.f32 %v2084_v54, %v2084_v54  ;;  %1481 = vmatpush3.bf16.msra.mxu0 %v1608_v44  ;;  %v1612_v49 = vld [vmem:[#allocation7 + $0x38] sm:$0xff]  }
 0x10a   :  { %v194_v5 = vsub.f32 %v2013_v6, %v178_v51  ;;  %v195_v55 = vsub.f32 %v2015_v7, %v179_v52  ;;  %1482 = vmatprep.subr.bf16.mxu0 %v1609_v47 }
 0x10b   :  { %242 = vadd.xlane.f32.xlu1 %v223_v50  ;;  %244 = vadd.xlane.f32.xlu0 %v224_v4  ;;  %v157_v56 = vpop.xlane.xlu0 %156  ;;  %v159_v57 = vpop.xlane.xlu1 %158 }
 0x10c   :  { %v180_v59 = vmul.f32 0.125, %v157_v56  ;;  %v181_v60 = vmul.f32 0.125, %v159_v57  ;;  %v2094_v61 = vsel %vm139_vm0, %v194_v5, 0.0  ;;  %v2098_v62 = vsel %vm139_vm0, %v195_v55, 0.0  ;;  %v2163_v55 = vld [vmem:[%s2343_s7] ss:$0 sm:$0xff] }
 0x10d   :  { %v226_v6 = vmul.f32 %v2094_v61, %v2094_v61  ;;  %v227_v18 = vmul.f32 %v2098_v62, %v2098_v62  ;;  %1483 = vmatpush3.bf16.msra.mxu0 %v1609_v47 }
 0x10e   :  { %v196_v7 = vsub.f32 %v2019_v8, %v180_v59  ;;  %v197_v63 = vsub.f32 %v2021_v9, %v181_v60  ;;  %1484 = vmatprep.subr.bf16.mxu0 %v1610_v48 }
 0x10f   :  { %246 = vadd.xlane.f32.xlu1 %v225_v58  ;;  %248 = vadd.xlane.f32.xlu0 %v226_v6  ;;  %v161_v16 = vpop.xlane.xlu0 %160  ;;  %v163_v17 = vpop.xlane.xlu1 %162 }
 0x110   :  { %v182_v19 = vmul.f32 0.125, %v161_v16  ;;  %v183_v20 = vmul.f32 0.125, %v163_v17  ;;  %v2108_v21 = vsel %vm139_vm0, %v196_v7, 0.0  ;;  %v2112_v22 = vsel %vm139_vm0, %v197_v63, 0.0 }
 0x111   :  { %v228_v8 = vmul.f32 %v2108_v21, %v2108_v21  ;;  %v229_v28 = vmul.f32 %v2112_v22, %v2112_v22  ;;  %1485 = vmatpush3.bf16.msra.mxu0 %v1610_v48 }
 0x112   :  { %v198_v9 = vsub.f32 %v2025_v10, %v182_v19  ;;  %v199_v23 = vsub.f32 %v2027_v11, %v183_v20  ;;  %1486 = vmatprep.subr.bf16.mxu0 %v1611_v25 }
 0x113   :  { %250 = vadd.xlane.f32.xlu1 %v227_v18  ;;  %252 = vadd.xlane.f32.xlu0 %v228_v8  ;;  %v165_v26 = vpop.xlane.xlu0 %164  ;;  %v167_v27 = vpop.xlane.xlu1 %166 }
 0x114   :  { %v184_v29 = vmul.f32 0.125, %v165_v26  ;;  %v185_v30 = vmul.f32 0.125, %v167_v27  ;;  %v2122_v31 = vsel %vm139_vm0, %v198_v9, 0.0  ;;  %v2126_v32 = vsel %vm139_vm0, %v199_v23, 0.0 }
 0x115   :  { %v230_v10 = vmul.f32 %v2122_v31, %v2122_v31  ;;  %v231_v36 = vmul.f32 %v2126_v32, %v2126_v32  ;;  %1487 = vmatpush3.bf16.msra.mxu0 %v1611_v25 }
 0x116   :  { %v200_v11 = vsub.f32 %v2031_v12, %v184_v29  ;;  %v201_v33 = vsub.f32 %v2033_v13, %v185_v30  ;;  %1488 = vmatprep.subr.bf16.mxu0 %v1612_v49 }
 0x117   :  { %254 = vadd.xlane.f32.xlu1 %v229_v28  ;;  %256 = vadd.xlane.f32.xlu0 %v230_v10  ;;  %v169_v34 = vpop.xlane.xlu0 %168  ;;  %v171_v35 = vpop.xlane.xlu1 %170 }
 0x118   :  { %v186_v40 = vmul.f32 0.125, %v169_v34  ;;  %v187_v0 = vmul.f32 0.125, %v171_v35  ;;  %v2136_v1 = vsel %vm139_vm0, %v200_v11, 0.0  ;;  %v2140_v41 = vsel %vm139_vm0, %v201_v33, 0.0 }
 0x119   :  { %v232_v12 = vmul.f32 %v2136_v1, %v2136_v1  ;;  %v233_v43 = vmul.f32 %v2140_v41, %v2140_v41  ;;  %1489 = vmatpush3.bf16.msra.mxu0 %v1612_v49 }
 0x11a   :  { %v202_v13 = vsub.f32 %v2037_v14, %v186_v40  ;;  %v203_v42 = vsub.f32 %v2041_v15, %v187_v0 }
 0x11b   :  { %258 = vadd.xlane.f32.xlu1 %v231_v36  ;;  %260 = vadd.xlane.f32.xlu0 %v232_v12 }
 0x11c   :  { %v2150_v2 = vsel %vm139_vm0, %v202_v13, 0.0  ;;  %v2154_v3 = vsel %vm139_vm0, %v203_v42, 0.0 }
 0x11d   :  { %v234_v14 = vmul.f32 %v2150_v2, %v2150_v2  ;;  %v235_v15 = vmul.f32 %v2154_v3, %v2154_v3 }
 0x11f   :  { %262 = vadd.xlane.f32.xlu1 %v233_v43  ;;  %264 = vadd.xlane.f32.xlu0 %v234_v14 }
 0x123   :  { %266 = vadd.xlane.f32.xlu1 %v235_v15 }
 0x166   :  { %v1524_v58 = vpop.f32.mrb[0].mxu1 }
 0x167   :  { %v707_v59 = vadd.f32 %v1524_v58, %v2163_v55  ;;  %v698_v60 = vpop.f32.mrb[1].mxu1 }
 0x168   :  { %v699_v63 = vadd.f32 %v2163_v55, %v698_v60  ;;  %v1525_v16 = vpop.f32.mrb[2].mxu1 }
 0x169   :  { %v827_v19 = vmax.f32 %v707_v59, 0.0  ;;  %v710_v20 = vadd.f32 %v1525_v16, %v2163_v55  ;;  %v701_v23 = vpop.f32.mrb[3].mxu1 }
 0x16a   :  { %v825_v24 = vmax.f32 %v699_v63, 0.0  ;;  %v702_v27 = vadd.f32 %v2163_v55, %v701_v23 }
 0x16b   :  { %v828_v26 = vmax.f32 %v710_v20, 0.0 }
 0x16c   :  { %v826_v33 = vmax.f32 %v702_v27, 0.0 }
 0x16d   :  { %v2169_v11 = vpack.c.bf16 %v828_v26, %v827_v19 }
 0x16e   :  { %v1528_v36 = vpop.f32.mrb[4].mxu1  ;;  %v2176_v40 = vpack.c.bf16 %v826_v33, %v825_v24 }
 0x16f   :  { %v723_v0 = vadd.f32 %v1528_v36, %v2163_v55  ;;  %v714_v12 = vpop.f32.mrb[5].mxu1 }
 0x170   :  { %v715_v44 = vadd.f32 %v2163_v55, %v714_v12  ;;  %v1529_v14 = vpop.f32.mrb[6].mxu1 }
 0x171   :  { %v831_v25 = vmax.f32 %v723_v0, 0.0  ;;  %v726_v49 = vadd.f32 %v1529_v14, %v2163_v55 }
 0x190   :  { %v237_v50 = vpop.xlane.xlu0 %236 }
 0x191   :  { %v268_v51 = vmul.f32 0.125, %v237_v50 }
 0x193   :  { %v284_v52 = vadd.f32 1e-05, %v268_v51 }
 0x194   :  { %v239_v4 = vpop.xlane.xlu1 %238  ;;  %v241_v5 = vpop.xlane.xlu0 %240 }
 0x195   :  { %1645 = vrsqrt.f32 %v284_v52  ;;  %v269_v56 = vmul.f32 0.125, %v239_v4  ;;  %v270_v57 = vmul.f32 0.125, %v241_v5  ;;  %v2185_v52 = vld [vmem:[%s2339_s3] ss:$0 sm:$0xff]  ;;  %v829_v4 = vmax.f32 %v715_v44, 0.0  ;;  %v717_v5 = vpop.f32.mrb[7].mxu1 }
 0x196   :  { %v718_v58 = vadd.f32 %v2163_v55, %v717_v5  ;;  %v1532_v23 = vpop.f32.mrb[8].mxu1 }
 0x197   :  { %v285_v6 = vadd.f32 1e-05, %v269_v56  ;;  %v286_v7 = vadd.f32 1e-05, %v270_v57  ;;  %v832_v57 = vmax.f32 %v726_v49, 0.0  ;;  %v739_v27 = vadd.f32 %v1532_v23, %v2163_v55 }
 0x198   :  { %v243_v17 = vpop.xlane.xlu1 %242  ;;  %v245_v18 = vpop.xlane.xlu0 %244  ;;  %v830_v19 = vmax.f32 %v718_v58, 0.0 }
 0x199   :  { %1647 = vrsqrt.f32 %v285_v6  ;;  %v271_v8 = vmul.f32 0.125, %v243_v17  ;;  %v272_v9 = vmul.f32 0.125, %v245_v18  ;;  %v2191_v18 = vpack.c.bf16 %v832_v57, %v831_v25 }
 0x19a   :  { %1649 = vrsqrt.f32 %v286_v7  ;;  %v2195_v26 = vpack.c.bf16 %v830_v19, %v829_v4 }
 0x19b   :  { %v287_v28 = vadd.f32 1e-05, %v271_v8  ;;  %v288_v29 = vadd.f32 1e-05, %v272_v9 }
 0x19c   :  { %v247_v30 = vpop.xlane.xlu1 %246  ;;  %v249_v10 = vpop.xlane.xlu0 %248 }
 0x19d   :  { %1651 = vrsqrt.f32 %v287_v28  ;;  %v273_v34 = vmul.f32 0.125, %v247_v30  ;;  %v274_v35 = vmul.f32 0.125, %v249_v10  ;;  %v730_v28 = vpop.f32.mrb[9].mxu1 }
 0x19e   :  { %1653 = vrsqrt.f32 %v288_v29  ;;  %v2200_v33 = vadd.f32 %v2163_v55, %v730_v28 }
 0x19f   :  { %v1646_v13 = vpop.eup %1645  ;;  %v289_v42 = vadd.f32 1e-05, %v273_v34  ;;  %v290_v43 = vadd.f32 1e-05, %v274_v35  ;;  %v1533_v34 = vpop.f32.mrb[10].mxu1 }
 0x1a0   :  { %v251_v15 = vpop.xlane.xlu1 %250  ;;  %v253_v47 = vpop.xlane.xlu0 %252  ;;  %v316_v48 = vmul.f32 %v1646_v13, %v2052_v37  ;;  %v835_v13 = vmax.f32 %v739_v27, 0.0 }
 0x1a1   :  { %1655 = vrsqrt.f32 %v289_v42  ;;  %v275_v50 = vmul.f32 0.125, %v251_v15  ;;  %v276_v51 = vmul.f32 0.125, %v253_v47  ;;  %v742_v42 = vadd.f32 %v1533_v34, %v2163_v55  ;;  %v733_v15 = vpop.f32.mrb[11].mxu1 }
 0x1a2   :  { %1657 = vrsqrt.f32 %v290_v43  ;;  %v338_v56 = vmul.f32 %v2174_v39, %v316_v48 }
 0x1a3   :  { %v1648_v37 = vpop.eup %1647  ;;  %v291_v59 = vadd.f32 1e-05, %v275_v50  ;;  %v292_v60 = vadd.f32 1e-05, %v276_v51  ;;  %v836_v4 = vmax.f32 %v742_v42, 0.0 }
 0x1a4   :  { %v1650_v6 = vpop.eup %1649  ;;  %v255_v7 = vpop.xlane.xlu1 %254  ;;  %v317_v16 = vmul.f32 %v1648_v37, %v2066_v45  ;;  %v360_v17 = vadd.f32 %v2185_v52, %v338_v56 }
 0x1a5   :  { %v257_v63 = vpop.xlane.xlu0 %256  ;;  %1659 = vrsqrt.f32 %v291_v59  ;;  %v277_v20 = vmul.f32 0.125, %v255_v7  ;;  %v318_v9 = vmul.f32 %v1650_v6, %v2056_v38 }
 0x1a6   :  { %v278_v8 = vmul.f32 0.125, %v257_v63  ;;  %1661 = vrsqrt.f32 %v292_v60  ;;  %v339_v24 = vmul.f32 %v2174_v39, %v317_v16  ;;  %v734_v60 = vadd.f32 %v2163_v55, %v733_v15  ;;  %v1536_v63 = vpop.f32.mrb[12].mxu1 }
 0x1a7   :  { %v1652_v45 = vpop.eup %1651  ;;  %v293_v29 = vadd.f32 1e-05, %v277_v20  ;;  %v340_v10 = vmul.f32 %v2174_v39, %v318_v9  ;;  %v746_v20 = vpop.f32.mrb[13].mxu1 }
 0x1a8   :  { %v294_v30 = vadd.f32 1e-05, %v278_v8  ;;  %v1654_v35 = vpop.eup %1653  ;;  %v259_v38 = vpop.xlane.xlu1 %258  ;;  %v361_v0 = vadd.f32 %v2185_v52, %v339_v24  ;;  %v319_v12 = vmul.f32 %v1652_v45, %v2070_v46  ;;  %v833_v46 = vmax.f32 %v2200_v33, 0.0 }
 0x1a9   :  { %v261_v36 = vpop.xlane.xlu0 %260  ;;  %1663 = vrsqrt.f32 %v293_v29  ;;  %v279_v43 = vmul.f32 0.125, %v259_v38  ;;  %v362_v14 = vadd.f32 %v2185_v52, %v340_v10  ;;  %v320_v25 = vmul.f32 %v1654_v35, %v2080_v53  ;;  %v1537_v27 = vpop.f32.mrb[14].mxu1 }
 0x1aa   :  { %v280_v44 = vmul.f32 0.125, %v261_v36  ;;  %1665 = vrsqrt.f32 %v294_v30  ;;  %v376_v47 = vpack.c.bf16 %v361_v0, %v360_v17  ;;  %v341_v48 = vmul.f32 %v2174_v39, %v319_v12  ;;  %v749_v33 = vpop.f32.mrb[15].mxu1 }
 0x1ab   :  { %v1656_v49 = vpop.eup %1655  ;;  %v295_v50 = vadd.f32 1e-05, %v279_v43  ;;  %v342_v59 = vmul.f32 %v2174_v39, %v320_v25  ;;  %v2217_v24 = vpack.c.bf16 %v836_v4, %v835_v13  ;;  %v834_v30 = vmax.f32 %v734_v60, 0.0 }
 0x1ac   :  { %v296_v51 = vadd.f32 1e-05, %v280_v44  ;;  %v1658_v5 = vpop.eup %1657  ;;  %v263_v56 = vpop.xlane.xlu1 %262  ;;  %1490 = vmatprep.mubr.bf16.mxu0 %v376_v47  ;;  %v363_v58 = vadd.f32 %v2185_v52, %v341_v48  ;;  %v321_v37 = vmul.f32 %v1656_v49, %v2084_v54  ;;  %v755_v10 = vadd.f32 %v1536_v63, %v2163_v55 }
 0x1ad   :  { %v265_v57 = vpop.xlane.xlu0 %264  ;;  %1667 = vrsqrt.f32 %v295_v50  ;;  %v281_v53 = vmul.f32 0.125, %v263_v56  ;;  %v322_v7 = vmul.f32 %v1658_v5, %v2094_v61  ;;  %v364_v19 = vadd.f32 %v2185_v52, %v342_v59  ;;  %v1540_v50 = vpop.f32.mrb[16].mxu1 }
 0x1ae   :  { %v282_v6 = vmul.f32 0.125, %v265_v57  ;;  %1669 = vrsqrt.f32 %v296_v51  ;;  %v377_v16 = vpack.c.bf16 %v363_v58, %v362_v14  ;;  %v343_v17 = vmul.f32 %v2174_v39, %v321_v37  ;;  %v762_v56 = vpop.f32.mrb[17].mxu1 }
 0x1af   :  { %v1660_v8 = vpop.eup %1659  ;;  %v297_v9 = vadd.f32 1e-05, %v281_v53  ;;  %v344_v23 = vmul.f32 %v2174_v39, %v322_v7  ;;  %v2225_v12 = vpack.c.bf16 %v834_v30, %v833_v46  ;;  %v839_v43 = vmax.f32 %v755_v10, 0.0  ;;  %v1541_v60 = vpop.f32.mrb[18].mxu1 }
 0x1b0   :  { %v298_v54 = vadd.f32 1e-05, %v282_v6  ;;  %v1662_v28 = vpop.eup %1661  ;;  %v267_v45 = vpop.xlane.xlu1 %266  ;;  %1491 = vmatmul.mubr.bf16.vlgmr.msra.gmra.mrb[0].mxu0 %v377_v16  ;;  %v365_v61 = vadd.f32 %v2185_v52, %v343_v17  ;;  %v323_v29 = vmul.f32 %v1660_v8, %v2098_v62  ;;  %v747_v44 = vadd.f32 %v2163_v55, %v746_v20 }
 0x1b1   :  { %1671 = vrsqrt.f32 %v297_v9  ;;  %v283_v34 = vmul.f32 0.125, %v267_v45  ;;  %v366_v35 = vadd.f32 %v2185_v52, %v344_v23  ;;  %v324_v38 = vmul.f32 %v1662_v28, %v2108_v21  ;;  %v765_v16 = vpop.f32.mrb[19].mxu1 }
 0x1b2   :  { %1673 = vrsqrt.f32 %v298_v54  ;;  %v378_v36 = vpack.c.bf16 %v365_v61, %v364_v19  ;;  %v345_v0 = vmul.f32 %v2174_v39, %v323_v29  ;;  %v758_v21 = vadd.f32 %v1537_v27, %v2163_v55 }
 0x1b3   :  { %v1664_v13 = vpop.eup %1663  ;;  %v299_v42 = vadd.f32 1e-05, %v283_v34  ;;  %v346_v62 = vmul.f32 %v2174_v39, %v324_v38  ;;  %v750_v48 = vadd.f32 %v2163_v55, %v749_v33  ;;  %v837_v49 = vmax.f32 %v747_v44, 0.0  ;;  %v1544_v33 = vpop.f32.mrb[20].mxu1 }
 0x1b4   :  { %v1666_v14 = vpop.eup %1665  ;;  %1494 = vmatprep.mubr.bf16.mxu0 %v378_v36  ;;  %v367_v15 = vadd.f32 %v2185_v52, %v345_v0  ;;  %v325_v47 = vmul.f32 %v1664_v13, %v2112_v22  ;;  %v840_v4 = vmax.f32 %v758_v21, 0.0  ;;  %v771_v37 = vadd.f32 %v1540_v50, %v2163_v55  ;;  %v778_v0 = vpop.f32.mrb[21].mxu1 }
 0x1b5   :  { %1675 = vrsqrt.f32 %v299_v42  ;;  %v326_v25 = vmul.f32 %v1666_v14, %v2122_v31  ;;  %v838_v5 = vmax.f32 %v750_v48, 0.0  ;;  %v368_v58 = vadd.f32 %v2185_v52, %v346_v62  ;;  %v1545_v44 = vpop.f32.mrb[22].mxu1 }
 0x1b6   :  { %v379_v51 = vpack.c.bf16 %v367_v15, %v366_v35  ;;  %v347_v46 = vmul.f32 %v2174_v39, %v325_v47  ;;  %v763_v59 = vadd.f32 %v2163_v55, %v762_v56  ;;  %v2241_v7 = vpack.c.bf16 %v840_v4, %v839_v43  ;;  %v781_v47 = vpop.f32.mrb[23].mxu1 }
 0x1b7   :  { %v1668_v57 = vpop.eup %1667  ;;  %v348_v22 = vmul.f32 %v2174_v39, %v326_v25  ;;  %v2243_v63 = vpack.c.bf16 %v838_v5, %v837_v49  ;;  %v843_v19 = vmax.f32 %v771_v37, 0.0  ;;  %v774_v54 = vadd.f32 %v1541_v60, %v2163_v55 }
 0x1b8   :  { %v1670_v53 = vpop.eup %1669  ;;  %1495 = vmatmul.mubr.bf16.gmra.mrb[4].mxu0 %v379_v51  ;;  %v369_v31 = vadd.f32 %v2185_v52, %v347_v46  ;;  %v327_v6 = vmul.f32 %v1668_v57, %v2126_v32  ;;  %v841_v20 = vmax.f32 %v763_v59, 0.0  ;;  %v766_v23 = vadd.f32 %v2163_v55, %v765_v16  ;;  %v1548_v57 = vpop.f32.mrb[24].mxu1 }
 0x1b9   :  { %v328_v17 = vmul.f32 %v1670_v53, %v2136_v1  ;;  %v370_v28 = vadd.f32 %v2185_v52, %v348_v22  ;;  %v844_v29 = vmax.f32 %v774_v54, 0.0  ;;  %v787_v43 = vadd.f32 %v1544_v33, %v2163_v55  ;;  %v1623_v33 = vld [vmem:[#allocation11 + $0x20] ss:$8 sps:$4 sm:$0xff]  }
 0x1ba   :  { %v380_v8 = vpack.c.bf16 %v369_v31, %v368_v58  ;;  %v349_v9 = vmul.f32 %v2174_v39, %v327_v6  ;;  %v842_v30 = vmax.f32 %v766_v23, 0.0  ;;  %v790_v15 = vadd.f32 %v1545_v44, %v2163_v55 }
 0x1bb   :  { %v1672_v27 = vpop.eup %1671  ;;  %v350_v32 = vmul.f32 %v2174_v39, %v328_v17  ;;  %v906_v38 = vpack.c.bf16 %v844_v29, %v843_v19  ;;  %v847_v21 = vmax.f32 %v787_v43, 0.0  ;;  %v782_v25 = vadd.f32 %v2163_v55, %v781_v47  ;;  %v1615_v29 = vld [vmem:[#allocation11 + $0x4] ss:$8 sps:$4 sm:$0xff]  }
 0x1bc   :  { %v1674_v45 = vpop.eup %1673  ;;  %1498 = vmatprep.mubr.bf16.mxu0 %v380_v8  ;;  %v371_v61 = vadd.f32 %v2185_v52, %v349_v9  ;;  %v329_v1 = vmul.f32 %v1672_v27, %v2140_v41  ;;  %v905_v36 = vpack.c.bf16 %v842_v30, %v841_v20  ;;  %v779_v41 = vadd.f32 %v2163_v55, %v778_v0  ;;  %v1613_v30 = vld [vmem:[#allocation11] ss:$8 sps:$4 sm:$0xff]   ;;  %v1637_v0 = vld [vmem:[#allocation11 + $0x64] ss:$8 sps:$4 sm:$0xff]  }
 0x1bd   :  { %v330_v10 = vmul.f32 %v1674_v45, %v2150_v2  ;;  %v372_v42 = vadd.f32 %v2185_v52, %v350_v32  ;;  %v848_v51 = vmax.f32 %v790_v15, 0.0  ;;  %v846_v46 = vmax.f32 %v782_v25, 0.0 }
 0x1be   :  { %v381_v34 = vpack.c.bf16 %v371_v61, %v370_v28  ;;  %v351_v35 = vmul.f32 %v2174_v39, %v329_v1  ;;  %1394 = vmatprep.subr.bf16.mxu0 %v905_v36  ;;  %v845_v48 = vmax.f32 %v779_v41, 0.0  ;;  %v803_v22 = vadd.f32 %v1548_v57, %v2163_v55  ;;  %v1636_v36 = vld [vmem:[#allocation11 + $0x50] ss:$8 sps:$4 sm:$0xff]  }
 0x1bf   :  { %v1676_v13 = vpop.eup %1675  ;;  %v352_v62 = vmul.f32 %v2174_v39, %v330_v10  ;;  %1395 = vmatpush3.bf16.msra.mxu0 %v2176_v40  ;;  %v908_v5 = vpack.c.bf16 %v848_v51, %v847_v21  ;;  %v794_v40 = vpop.f32.mrb[25].mxu1  ;;  %v1620_v10 = vld [vmem:[#allocation11 + $0x10] ss:$8 sps:$4 sm:$0xff]  }
 0x1c0   :  { %1499 = vmatmul.mubr.bf16.gmra.mrb[8].mxu0 %v381_v34  ;;  %v373_v2 = vadd.f32 %v2185_v52, %v351_v35  ;;  %v331_v14 = vmul.f32 %v1676_v13, %v2154_v3  ;;  %1396 = vmatprep.subr.bf16.mxu0 %v906_v38  ;;  %v907_v56 = vpack.c.bf16 %v846_v46, %v845_v48  ;;  %v851_v59 = vmax.f32 %v803_v22, 0.0  ;;  %v1628_v34 = vld [vmem:[#allocation11 + $0x30] ss:$8 sps:$4 sm:$0xff]   ;;  %v1631_v35 = vld [vmem:[#allocation11 + $0x40] ss:$8 sps:$4 sm:$0xff]  }
 0x1c1   :  { %v374_v4 = vadd.f32 %v2185_v52, %v352_v62  ;;  %v795_v37 = vadd.f32 %v2163_v55, %v794_v40  ;;  %v1634_v38 = vld [vmem:[#allocation11 + $0x54] ss:$8 sps:$4 sm:$0xff]   ;;  %v1639_v13 = vld [vmem:[#allocation11 + $0x60] ss:$8 sps:$4 sm:$0xff]   ;;  %v1644_v62 = vld [vmem:[#allocation11 + $0x70] ss:$8 sps:$4 sm:$0xff]  }
 0x1c2   :  { %v382_v49 = vpack.c.bf16 %v373_v2, %v372_v42  ;;  %v353_v50 = vmul.f32 %v2174_v39, %v331_v14  ;;  %v1549_v39 = vpop.f32.mrb[26].mxu1  ;;  %v1642_v42 = vld [vmem:[#allocation11 + $0x74] ss:$8 sps:$4 sm:$0xff]  }
 0x1c3   :  { %1397 = vmatpush3.bf16.msra.mxu0 %v2169_v11  ;;  %v806_v60 = vadd.f32 %v1549_v39, %v2163_v55  ;;  %v797_v53 = vpop.f32.mrb[27].mxu1  ;;  %v849_v31 = vmax.f32 %v795_v37, 0.0 }
 0x1c4   :  { %1502 = vmatprep.mubr.bf16.mxu0 %v382_v49  ;;  %v375_v3 = vadd.f32 %v2185_v52, %v353_v50  ;;  %1398 = vmatprep.subr.bf16.mxu0 %v907_v56  ;;  %v798_v52 = vadd.f32 %v2163_v55, %v797_v53  ;;  %v1552_v19 = vpop.f32.mrb[28].mxu1  ;;  %v1625_v53 = vld [vmem:[#allocation10 + $0x18] sm:$0xff]  }
 0x1c5   :  { %v852_v11 = vmax.f32 %v806_v60, 0.0  ;;  %v819_v20 = vadd.f32 %v1552_v19, %v2163_v55  ;;  %v810_v8 = vpop.f32.mrb[29].mxu1  ;;  %v1624_v60 = vld [vmem:[#allocation10 + $0x10] sm:$0xff]  }
 0x1c6   :  { %v383_v58 = vpack.c.bf16 %v375_v3, %v374_v4  ;;  %v850_v6 = vmax.f32 %v798_v52, 0.0  ;;  %v811_v9 = vadd.f32 %v2163_v55, %v810_v8  ;;  %v1553_v54 = vpop.f32.mrb[30].mxu1  ;;  %v1633_v52 = vld [vmem:[#allocation10 + $0x28] sm:$0xff]  }
 0x1c7   :  { %1399 = vmatpush3.bf16.msra.mxu0 %v2195_v26  ;;  %v910_v16 = vpack.c.bf16 %v852_v11, %v851_v59  ;;  %v855_v23 = vmax.f32 %v819_v20, 0.0  ;;  %v822_v27 = vadd.f32 %v1553_v54, %v2163_v55  ;;  %v813_v28 = vpop.f32.mrb[31].mxu1  ;;  %v1617_v59 = vld [vmem:[#allocation10 + $0x8] sm:$0xff]   ;;  %v1640_v11 = vld [vmem:[#allocation10 + $0x30] sm:$0xff]  }
 0x1c8   :  { %1503 = vmatmul.mubr.bf16.gmra.mrb[12].mxu0 %v383_v58  ;;  %1400 = vmatprep.subr.bf16.mxu0 %v908_v5  ;;  %v909_v17 = vpack.c.bf16 %v850_v6, %v849_v31  ;;  %v853_v26 = vmax.f32 %v811_v9, 0.0  ;;  %v814_v32 = vadd.f32 %v2163_v55, %v813_v28  ;;  %v1621_v55 = vld [vmem:[#allocation11 + $0x24] ss:$8 sps:$4 sm:$0xff]   ;;  %v1641_v6 = vld [vmem:[#allocation10 + $0x38] sm:$0xff]  }
 0x1c9   :  { %v856_v45 = vmax.f32 %v822_v27, 0.0  ;;  %1025 = vmatprep.mubr.bf16.mxu0 %v1615_v29  ;;  %v1632_v31 = vld [vmem:[#allocation10 + $0x20] sm:$0xff]  }
 0x1cb   :  { %1401 = vmatpush3.bf16.msra.mxu0 %v2191_v18  ;;  %v854_v18 = vmax.f32 %v814_v32, 0.0  ;;  %v912_v61 = vpack.c.bf16 %v856_v45, %v855_v23 }
 0x1cc   :  { %1402 = vmatprep.subr.bf16.mxu0 %v909_v17 }
 0x1cd   :  { %v911_v1 = vpack.c.bf16 %v854_v18, %v853_v26 }
 0x1cf   :  { %1403 = vmatpush3.bf16.msra.mxu0 %v2225_v12  ;;  %v1618_v12 = vld [vmem:[#allocation11 + $0x14] ss:$8 sps:$4 sm:$0xff]  }
 0x1d0   :  { %1404 = vmatprep.subr.bf16.mxu0 %v910_v16 }
 0x1d3   :  { %1405 = vmatpush3.bf16.msra.mxu0 %v2217_v24  ;;  %v1626_v24 = vld [vmem:[#allocation11 + $0x34] ss:$8 sps:$4 sm:$0xff]  }
 0x1d4   :  { %1406 = vmatprep.subr.bf16.mxu0 %v911_v1 }
 0x1d7   :  { %1407 = vmatpush3.bf16.msra.mxu0 %v2243_v63  ;;  %v1629_v63 = vld [vmem:[#allocation11 + $0x44] ss:$8 sps:$4 sm:$0xff]  }
 0x1d8   :  { %1408 = vmatprep.subr.bf16.mxu0 %v912_v61 }
 0x1db   :  { %1409 = vmatpush3.bf16.msra.mxu0 %v2241_v7  ;;  %v1616_v7 = vld [vmem:[#allocation10] sm:$0xff]  }
 0x1dc   :  { %1570 = vmatprep.mubr.bf16.mxu1 %v1616_v7 }
 0x1de   :  { %1026 = vmatmul.mubr.bf16.vlgmr.msra.gmra.mrb[16].mxu0 %v1613_v30 }
 0x1df   :  { %1033 = vmatprep.mubr.bf16.mxu0 %v1618_v12 }
 0x1e6   :  { %1034 = vmatmul.mubr.bf16.gmra.mrb[20].mxu0 %v1620_v10 }
 0x1e7   :  { %1041 = vmatprep.mubr.bf16.mxu0 %v1621_v55 }
 0x1ee   :  { %1042 = vmatmul.mubr.bf16.gmra.mrb[24].mxu0 %v1623_v33 }
 0x1ef   :  { %1049 = vmatprep.mubr.bf16.mxu0 %v1626_v24 }
 0x1f6   :  { %1050 = vmatmul.mubr.bf16.gmra.mrb[28].mxu0 %v1628_v34 }
 0x1f7   :  { %1057 = vmatprep.mubr.bf16.mxu0 %v1629_v63 }
 0x1fe   :  { %1058 = vmatmul.mubr.bf16.gmra.mrb[32].mxu0 %v1631_v35 }
 0x1ff   :  { %1065 = vmatprep.mubr.bf16.mxu0 %v1634_v38 }
 0x206   :  { %1066 = vmatmul.mubr.bf16.gmra.mrb[36].mxu0 %v1636_v36 }
 0x207   :  { %1073 = vmatprep.mubr.bf16.mxu0 %v1637_v0 }
 0x20e   :  { %1074 = vmatmul.mubr.bf16.gmra.mrb[40].mxu0 %v1639_v13 }
 0x20f   :  { %1081 = vmatprep.mubr.bf16.mxu0 %v1642_v42 }
 0x216   :  { %1082 = vmatmul.mubr.bf16.gmra.mrb[44].mxu0 %v1644_v62 }
 0x283   :  { %v1492_v43 = vpop.f32.mrb[0].mxu0 }
 0x284   :  { %v482_v41 = vpop.f32.mrb[1].mxu0 }
 0x285   :  { %v1493_v44 = vpop.f32.mrb[2].mxu0 }
 0x286   :  { %v874_v2 = vpack.c.bf16 %v1493_v44, %v1492_v43  ;;  %v485_v14 = vpop.f32.mrb[3].mxu0 }
 0x287   :  { %v873_v15 = vpack.c.bf16 %v485_v14, %v482_v41 }
 0x289   :  { %1554 = vmatprep.subr.bf16.mxu1 %v873_v15 }
 0x28a   :  { %1555 = vmatpush3.bf16.msra.mxu1 %v873_v15 }
 0x28b   :  { %v1496_v47 = vpop.f32.mrb[4].mxu0  ;;  %1556 = vmatprep.subr.bf16.mxu1 %v874_v2 }
 0x28c   :  { %v498_v21 = vpop.f32.mrb[5].mxu0 }
 0x28d   :  { %v1497_v48 = vpop.f32.mrb[6].mxu0 }
 0x28e   :  { %v876_v25 = vpack.c.bf16 %v1497_v48, %v1496_v47  ;;  %v501_v49 = vpop.f32.mrb[7].mxu0  ;;  %1557 = vmatpush3.bf16.msra.mxu1 %v874_v2 }
 0x28f   :  { %v875_v50 = vpack.c.bf16 %v501_v49, %v498_v21 }
 0x291   :  { %1558 = vmatprep.subr.bf16.mxu1 %v875_v50 }
 0x292   :  { %1559 = vmatpush3.bf16.msra.mxu1 %v875_v50 }
 0x293   :  { %v1500_v51 = vpop.f32.mrb[8].mxu0  ;;  %1560 = vmatprep.subr.bf16.mxu1 %v876_v25 }
 0x294   :  { %v514_v46 = vpop.f32.mrb[9].mxu0 }
 0x295   :  { %v1501_v4 = vpop.f32.mrb[10].mxu0 }
 0x296   :  { %v878_v3 = vpack.c.bf16 %v1501_v4, %v1500_v51  ;;  %v517_v5 = vpop.f32.mrb[11].mxu0  ;;  %1561 = vmatpush3.bf16.msra.mxu1 %v876_v25 }
 0x297   :  { %v877_v56 = vpack.c.bf16 %v517_v5, %v514_v46  ;;  %v2297_v5 = vld [vmem:[%s2341_s5] ss:$0 sm:$0xff]  ;;  %s1851_s5 = smov [#allocation13]  }
 0x298   :  { %s1295_s6 = sshll.u32 %s1851_s5, 4  ;;  %s1296_s6 = int_to_ptr.vmem [resolvable:$true] %s1295_s6 }
 0x299   :  { %1562 = vmatprep.subr.bf16.mxu1 %v877_v56  ;;  %s1809_s28 = scalar_lea.vmem %s1296_s6, 2048  ;;  %p1814_p7 = scmp.lt.s32.totalorder %s1296_s6, %s1296_s6 }
 0x29a   :  { %1563 = vmatpush3.bf16.msra.mxu1 %v877_v56  ;;  %p1810_p6 = scmp.ne.s32.totalorder %s1296_s6, %s1809_s28  ;;  %p1815_p8 = scmp.lt.s32.totalorder %s1809_s28, %s1809_s28 }
 0x29b   :  { %v1504_v57 = vpop.f32.mrb[12].mxu0  ;;  %1564 = vmatprep.subr.bf16.mxu1 %v878_v3 }
 0x29c   :  { %v530_v58 = vpop.f32.mrb[13].mxu0  ;;  %p1816_p9 = por %p1815_p8, %p1814_p7 }
 0x29d   :  { %v1505_v22 = vpop.f32.mrb[14].mxu0 }
 0x29e   :  { %v880_v40 = vpack.c.bf16 %v1505_v22, %v1504_v57  ;;  %v533_v37 = vpop.f32.mrb[15].mxu0  ;;  %1565 = vmatpush3.bf16.msra.mxu1 %v878_v3  ;;  %p1817_p10 = pnand %p1816_p9, %p1810_p6 }
 0x29f   :  { %v879_v39 = vpack.c.bf16 %v533_v37, %v530_v58 }
 0x2a1   :  { %1566 = vmatprep.subr.bf16.mxu1 %v879_v39 }
 0x2a2   :  { %1567 = vmatpush3.bf16.msra.mxu1 %v879_v39 }
 0x2a3   :  { %1568 = vmatprep.subr.bf16.mxu1 %v880_v40 }
 0x2a6   :  { %1569 = vmatpush3.bf16.msra.mxu1 %v880_v40 }
 0x2a9   :  { %1571 = vmatmul.mubr.bf16.vlgmr.msra.gmra.mrb[32].mxu1 %v1617_v59 }
 0x2aa   :  { %1574 = vmatprep.mubr.bf16.mxu1 %v1624_v60 }
 0x2b1   :  { %1575 = vmatmul.mubr.bf16.gmra.mrb[36].mxu1 %v1625_v53  ;;  %v1410_v16 = vpop.f32.mrb[16].mxu0 }
 0x2b2   :  { %1578 = vmatprep.mubr.bf16.mxu1 %v1632_v31  ;;  %v1411_v17 = vpop.f32.mrb[17].mxu0 }
 0x2b3   :  { %v1412_v19 = vadd.f32 %v1411_v17, %v1410_v16  ;;  %v1413_v20 = vpop.f32.mrb[18].mxu0 }
 0x2b4   :  { %v1414_v8 = vpop.f32.mrb[19].mxu0 }
 0x2b5   :  { %v1415_v9 = vadd.f32 %v1414_v8, %v1413_v20 }
 0x2b9   :  { %1579 = vmatmul.mubr.bf16.gmra.mrb[40].mxu1 %v1633_v52  ;;  %v1416_v54 = vpop.f32.mrb[20].mxu0 }
 0x2ba   :  { %1582 = vmatprep.mubr.bf16.mxu1 %v1640_v11  ;;  %v1417_v23 = vpop.f32.mrb[21].mxu0 }
 0x2bb   :  { %v1419_v27 = vpop.f32.mrb[22].mxu0  ;;  %v1418_v26 = vadd.f32 %v1417_v23, %v1416_v54 }
 0x2bc   :  { %v1420_v28 = vpop.f32.mrb[23].mxu0 }
 0x2bd   :  { %v1421_v32 = vadd.f32 %v1420_v28, %v1419_v27 }
 0x2c1   :  { %1583 = vmatmul.mubr.bf16.gmra.mrb[44].mxu1 %v1641_v6  ;;  %v1422_v45 = vpop.f32.mrb[24].mxu0 }
 0x2c2   :  { %v1423_v18 = vpop.f32.mrb[25].mxu0 }
 0x2c3   :  { %v1425_v61 = vpop.f32.mrb[26].mxu0  ;;  %v1424_v29 = vadd.f32 %v1423_v18, %v1422_v45 }
 0x2c4   :  { %v1426_v1 = vpop.f32.mrb[27].mxu0 }
 0x2c5   :  { %v1427_v30 = vadd.f32 %v1426_v1, %v1425_v61 }
 0x2c9   :  { %v1428_v12 = vpop.f32.mrb[28].mxu0 }
 0x2ca   :  { %v1429_v10 = vpop.f32.mrb[29].mxu0 }
 0x2cb   :  { %v1431_v55 = vpop.f32.mrb[30].mxu0  ;;  %v1430_v24 = vadd.f32 %v1429_v10, %v1428_v12 }
 0x2cc   :  { %v1432_v33 = vpop.f32.mrb[31].mxu0 }
 0x2cd   :  { %v1433_v34 = vadd.f32 %v1432_v33, %v1431_v55 }
 0x2d1   :  { %v1434_v63 = vpop.f32.mrb[32].mxu0 }
 0x2d2   :  { %v1435_v35 = vpop.f32.mrb[33].mxu0 }
 0x2d3   :  { %v1437_v7 = vpop.f32.mrb[34].mxu0  ;;  %v2282_v36 = vadd.f32 %v1435_v35, %v1434_v63 }
 0x2d4   :  { %v1438_v38 = vpop.f32.mrb[35].mxu0 }
 0x2d5   :  { %v2284_v0 = vadd.f32 %v1438_v38, %v1437_v7 }
 0x2d9   :  { %v1440_v13 = vpop.f32.mrb[36].mxu0 }
 0x2da   :  { %v1441_v42 = vpop.f32.mrb[37].mxu0 }
 0x2db   :  { %v1443_v62 = vpop.f32.mrb[38].mxu0  ;;  %v1442_v41 = vadd.f32 %v1441_v42, %v1440_v13 }
 0x2dc   :  { %v1444_v43 = vpop.f32.mrb[39].mxu0 }
 0x2dd   :  { %v1445_v44 = vadd.f32 %v1444_v43, %v1443_v62 }
 0x2e1   :  { %v1446_v2 = vpop.f32.mrb[40].mxu0 }
 0x2e2   :  { %v1447_v14 = vpop.f32.mrb[41].mxu0 }
 0x2e3   :  { %v1449_v15 = vpop.f32.mrb[42].mxu0  ;;  %v2286_v21 = vadd.f32 %v1447_v14, %v1446_v2 }
 0x2e4   :  { %v1450_v47 = vpop.f32.mrb[43].mxu0 }
 0x2e5   :  { %v2288_v48 = vadd.f32 %v1450_v47, %v1449_v15 }
 0x2e9   :  { %v1452_v25 = vpop.f32.mrb[44].mxu0 }
 0x2ea   :  { %v1453_v49 = vpop.f32.mrb[45].mxu0 }
 0x2eb   :  { %v1455_v50 = vpop.f32.mrb[46].mxu0  ;;  %v2290_v46 = vadd.f32 %v1453_v49, %v1452_v25 }
 0x2ec   :  { %v1456_v51 = vpop.f32.mrb[47].mxu0 }
 0x2ed   :  { %v2292_v4 = vadd.f32 %v1456_v51, %v1455_v50 }
 0x37c   :  { %v1572_v3 = vpop.f32.mrb[32].mxu1 }
 0x37d   :  { %v1172_v56 = vpop.f32.mrb[33].mxu1  ;;  %v1181_v57 = vadd.f32 %v1572_v3, %v1418_v26 }
 0x37e   :  { %v1173_v58 = vadd.f32 %v1412_v19, %v1172_v56  ;;  %v1573_v22 = vpop.f32.mrb[34].mxu1 }
 0x37f   :  { %v1175_v40 = vpop.f32.mrb[35].mxu1  ;;  %v1244_v37 = vadd.f32 %v2297_v5, %v1181_v57  ;;  %v1184_v39 = vadd.f32 %v1573_v22, %v1421_v32 }
 0x380   :  { %v1242_v59 = vadd.f32 %v2297_v5, %v1173_v58  ;;  %v1176_v60 = vadd.f32 %v1415_v9, %v1175_v40 }
 0x381   :  { %v1260_v53 = vmax.f32 %v1244_v37, 0.0  ;;  %v1245_v31 = vadd.f32 %v2297_v5, %v1184_v39 }
 0x382   :  { %v1258_v52 = vmax.f32 %v1242_v59, 0.0  ;;  %v1243_v11 = vadd.f32 %v2297_v5, %v1176_v60 }
 0x383   :  { %1276 = vst [vmem:[#allocation13 + $0x10] sm:$0xff] %v1260_v53  ;;  %v1261_v6 = vmax.f32 %v1245_v31, 0.0 }
 0x384   :  { %1274 = vst [vmem:[#allocation13] sm:$0xff] %v1258_v52  ;;  %v1259_v16 = vmax.f32 %v1243_v11, 0.0  ;;  %v1576_v17 = vpop.f32.mrb[36].mxu1 }
 0x385   :  { %1277 = vst [vmem:[#allocation13 + $0x18] sm:$0xff] %v1261_v6  ;;  %v1188_v19 = vpop.f32.mrb[37].mxu1  ;;  %v1197_v20 = vadd.f32 %v1576_v17, %v1430_v24 }
 0x386   :  { %1275 = vst [vmem:[#allocation13 + $0x8] sm:$0xff] %v1259_v16  ;;  %v1189_v8 = vadd.f32 %v1424_v29, %v1188_v19  ;;  %v1577_v54 = vpop.f32.mrb[38].mxu1 }
 0x387   :  { %v1191_v23 = vpop.f32.mrb[39].mxu1  ;;  %v1248_v9 = vadd.f32 %v2297_v5, %v1197_v20  ;;  %v1200_v27 = vadd.f32 %v1577_v54, %v1433_v34 }
 0x388   :  { %v1246_v28 = vadd.f32 %v2297_v5, %v1189_v8  ;;  %v1192_v26 = vadd.f32 %v1427_v30, %v1191_v23 }
 0x389   :  { %v1264_v32 = vmax.f32 %v1248_v9, 0.0  ;;  %v1249_v45 = vadd.f32 %v2297_v5, %v1200_v27 }
 0x38a   :  { %v1262_v18 = vmax.f32 %v1246_v28, 0.0  ;;  %v1247_v61 = vadd.f32 %v2297_v5, %v1192_v26 }
 0x38b   :  { %1280 = vst [vmem:[#allocation13 + $0x30] sm:$0xff] %v1264_v32  ;;  %v1265_v1 = vmax.f32 %v1249_v45, 0.0 }
 0x38c   :  { %1278 = vst [vmem:[#allocation13 + $0x20] sm:$0xff] %v1262_v18  ;;  %v1263_v12 = vmax.f32 %v1247_v61, 0.0  ;;  %v1580_v10 = vpop.f32.mrb[40].mxu1 }
 0x38d   :  { %1281 = vst [vmem:[#allocation13 + $0x38] sm:$0xff] %v1265_v1  ;;  %v1204_v29 = vpop.f32.mrb[41].mxu1  ;;  %v1213_v55 = vadd.f32 %v1580_v10, %v1442_v41 }
 0x38e   :  { %1279 = vst [vmem:[#allocation13 + $0x28] sm:$0xff] %v1263_v12  ;;  %v1205_v33 = vadd.f32 %v2282_v36, %v1204_v29  ;;  %v1581_v24 = vpop.f32.mrb[42].mxu1 }
 0x38f   :  { %v1207_v34 = vpop.f32.mrb[43].mxu1  ;;  %v1252_v30 = vadd.f32 %v2297_v5, %v1213_v55  ;;  %v1216_v63 = vadd.f32 %v1581_v24, %v1445_v44 }
 0x390   :  { %v1250_v35 = vadd.f32 %v2297_v5, %v1205_v33  ;;  %v1208_v7 = vadd.f32 %v2284_v0, %v1207_v34 }
 0x391   :  { %v1268_v38 = vmax.f32 %v1252_v30, 0.0  ;;  %v1253_v13 = vadd.f32 %v2297_v5, %v1216_v63 }
 0x392   :  { %v1266_v42 = vmax.f32 %v1250_v35, 0.0  ;;  %v1251_v62 = vadd.f32 %v2297_v5, %v1208_v7 }
 0x393   :  { %1284 = vst [vmem:[#allocation13 + $0x50] sm:$0xff] %v1268_v38  ;;  %v1269_v43 = vmax.f32 %v1253_v13, 0.0 }
 0x394   :  { %1282 = vst [vmem:[#allocation13 + $0x40] sm:$0xff] %v1266_v42  ;;  %v1267_v41 = vmax.f32 %v1251_v62, 0.0  ;;  %v1584_v36 = vpop.f32.mrb[44].mxu1 }
 0x395   :  { %1285 = vst [vmem:[#allocation13 + $0x58] sm:$0xff] %v1269_v43  ;;  %v1220_v2 = vpop.f32.mrb[45].mxu1  ;;  %v1229_v14 = vadd.f32 %v1584_v36, %v2290_v46 }
 0x396   :  { %1283 = vst [vmem:[#allocation13 + $0x48] sm:$0xff] %v1267_v41  ;;  %v1221_v44 = vadd.f32 %v2286_v21, %v1220_v2  ;;  %v1585_v15 = vpop.f32.mrb[46].mxu1 }
 0x397   :  { %v1223_v0 = vpop.f32.mrb[47].mxu1  ;;  %v1256_v47 = vadd.f32 %v2297_v5, %v1229_v14  ;;  %v1232_v25 = vadd.f32 %v1585_v15, %v2292_v4 }
 0x398   :  { %v1254_v49 = vadd.f32 %v2297_v5, %v1221_v44  ;;  %v1224_v50 = vadd.f32 %v2288_v48, %v1223_v0 }
 0x399   :  { %v1272_v51 = vmax.f32 %v1256_v47, 0.0  ;;  %v1257_v3 = vadd.f32 %v2297_v5, %v1232_v25 }
 0x39a   :  { %v1270_v56 = vmax.f32 %v1254_v49, 0.0  ;;  %v1255_v46 = vadd.f32 %v2297_v5, %v1224_v50 }
 0x39b   :  { %1288 = vst [vmem:[#allocation13 + $0x70] sm:$0xff] %v1272_v51  ;;  %v1273_v21 = vmax.f32 %v1257_v3, 0.0 }
 0x39c   :  { %1286 = vst [vmem:[#allocation13 + $0x60] sm:$0xff] %v1270_v56  ;;  %v1271_v57 = vmax.f32 %v1255_v46, 0.0 }
 0x39d   :  { %1289 = vst [vmem:[#allocation13 + $0x78] sm:$0xff] %v1273_v21 }
 0x39e   :  { %1287 = vst [vmem:[#allocation13 + $0x68] sm:$0xff] %v1271_v57 }
 0x39f   :  { %1820 = shalt.err (!%p1817_p10)
}
 0x3a0   :  { %s1821_s1 = scalar_lea.hbm %s2346_s10, 2048 }
 0x3a1   :  { %p1822_p11 = scmp.ne.s32.totalorder %s2346_s10, %s1821_s1  ;;  %p1825_p12 = scmp.lt.u32.totalorder %s1821_s1, %s2346_s10 }
 0x3a3   :  { %p1827_p13 = pnand %p1825_p12, %p1822_p11 }
 0x3a5   :  { %1830 = shalt.err (!%p1827_p13)
}
 0x3a6   :  { %1301 = dma.vmem_to_hbm [thread:$0]  %s1296_s6, 2048, %s2346_s10, [#allocation4], %s1842_s23, %s1842_s23, %s1843_s24  }
 0x3a7   :  { %1839 = dma.done.wait [#allocation4], 2048  }
 0x3a8   :  { %1840 = vsyncadd [#allocation4], 4294965248 }
 0x3a9   :  { %1305 = vsyncpa [#allocation3], 1 }
 0x3aa   :  { %1306 = vsyncpa [#allocation6], 1 }
 0x3ab   :  { %1307 = vsyncpa [#allocation9], 1 }
 0x3ac   :  { %1308 = vsyncpa [#allocation12], 1 }
 0x3ad   :  { %1309 = vsyncpa [#allocation4], 1 }

</bundles_post_ra>
